<compile_context>
chip_gen: v7x
topology: tpu7x:2x2x1
jax: 0.10.0
libtpu: 0.0.40
codegen_flags: <defaults>
</compile_context>

<pallas_src>
import functools
import math

import jax
import jax.numpy as jnp
from jax.experimental import pallas as pl
from jax.experimental.pallas import tpu as pltpu


MAX_TILE_N = 2048   # rows per grid step cap (sweep 512-2048; 2048 fits VMEM easily)
LANE = 128          # TPU lane width — output padded to a multiple of this


# ----------------------------- glue (plain JAX) -----------------------------

def timestep_embedding(timesteps, dim, max_period=10000):
    """Sinusoidal timestep embeddings, matches the PyTorch reference."""
    half = dim // 2
    freqs = jnp.exp(
        -math.log(max_period) * jnp.arange(half, dtype=jnp.float32) / half
    )
    args = timesteps[:, None].astype(jnp.float32) * freqs[None, :]
    emb = jnp.concatenate([jnp.cos(args), jnp.sin(args)], axis=-1)
    if dim % 2:
        emb = jnp.concatenate([emb, jnp.zeros_like(emb[:, :1])], axis=-1)
    return emb


def _xavier_normal(key, out_dim, in_dim):
    std = math.sqrt(2.0 / (in_dim + out_dim))
    return std * jax.random.normal(key, (out_dim, in_dim), dtype=jnp.float32)


def init_unet_params(key, in_dim0, out_dim0, emb_size):
    """Deterministic parameter init mirroring UNet.__init__ / init_weights.

    Weights are stored in torch layout (out, in), f32 — used directly by the
    pure-JAX reference; prepare_unet_operands converts them for the kernel.
    """
    layer_shapes = {
        "emb": (emb_size, emb_size),
        "enc1": (64, in_dim0 + emb_size),
        "enc2": (128, 64),
        "enc3": (256, 128),
        "dec3": (128, 256),
        "dec2": (64, 256),
        "dec1": (out_dim0, 128),
    }
    params = {}
    keys = jax.random.split(key, 2 * len(layer_shapes))
    for i, (name, (o, c)) in enumerate(layer_shapes.items()):
        w = _xavier_normal(keys[2 * i], o, c)            # torch layout (out, in)
        b = 1e-6 * jax.random.normal(keys[2 * i + 1], (o,), dtype=jnp.float32)
        params[name] = (w, b)
    return params


def prepare_unet_operands(params, in_dim0, out_dim0, emb_size):
    """One-time weight prep.

    * transpose every Linear weight to (in, out),
    * fold emb_layer into enc1:
        cat([x, temb@We^T+be]) @ W1^T = x@W1x + temb@(We^T@W1e) + (be@W1e + b1)
      (the [cos|sin] trig features play the role of temb; an odd-dim zero
       column contributes nothing so its folded row is dropped),
    * split the decoder skip-concat weights so the kernel uses accumulated
      dots instead of lane concats,
    * pad dec1's output dim to a lane-dense multiple of 128,
    * cast weights to bf16; biases stay f32 as (1, out) rows.
    """
    out_pad = ((out_dim0 + LANE - 1) // LANE) * LANE
    half = emb_size // 2

    def wT(name):
        return jnp.transpose(params[name][0]).astype(jnp.float32)   # (in, out)

    def bias(name):
        return params[name][1].astype(jnp.float32)

    # enc1 split + emb_layer fold.
    w1T = wT("enc1")                                   # (in_dim0 + emb, 64)
    w1x = w1T[:in_dim0]                                # (in_dim0, 64)
    w1e = w1T[in_dim0:]                                # (emb, 64)
    w1e_fold = (wT("emb") @ w1e)[: 2 * half]           # (2*half, 64)
    b1_fold = bias("emb") @ w1e + bias("enc1")

    # dec2 acts on cat([d3(128), e2(128)]) -> split into two K=128 dots.
    wd2T = wT("dec2")                                  # (256, 64)
    wd2a, wd2b = wd2T[:128], wd2T[128:]

    # dec1 acts on cat([d2(64), e1(64)]) -> split into two K=64 dots;
    # pad its out-dim to a lane multiple for an unmasked store.
    wd1T = jnp.pad(wT("dec1"), ((0, 0), (0, out_pad - out_dim0)))   # (128, out_pad)
    wd1a, wd1b = wd1T[:64], wd1T[64:]
    bd1 = jnp.pad(bias("dec1"), ((0, out_pad - out_dim0),))

    W = lambda a: a.astype(jnp.bfloat16)
    B = lambda a: a[None, :].astype(jnp.float32)       # (1, out) for broadcast

    return (
        W(w1x), W(w1e_fold), B(b1_fold),               # enc1 (+ folded emb_layer)
        W(wT("enc2")), B(bias("enc2")),                # (64, 128)
        W(wT("enc3")), B(bias("enc3")),                # (128, 256)
        W(wT("dec3")), B(bias("dec3")),                # (256, 128)
        W(wd2a), W(wd2b), B(bias("dec2")),             # dec2 split dots
        W(wd1a), W(wd1b), B(bd1),                      # dec1 split dots, out_pad
    )


# ------------------------------- Pallas kernel -------------------------------

def _unet_kernel(
    x_ref,                                   # (TILE_N, in_dim0) f32
    trig_ref,                                # (TILE_N, 2*half)  bf16 = [cos | sin]
    w1x, w1e, b1,
    w2, b2, w3, b3,
    wd3, bd3,
    wd2a, wd2b, bd2,
    wd1a, wd1b, bd1,
    out_ref,                                 # (TILE_N, out_pad) bf16
):
    f32 = jnp.float32
    bf16 = jnp.bfloat16

    def dot(a, w_ref):
        return jnp.dot(a, w_ref[...], preferred_element_type=f32)

    def act(pre):                            # ReLU + cast for the next MXU pass
        return jnp.maximum(pre, 0.0).astype(bf16)

    # TODO(synk): nn.Dropout(p=0.5) is treated as eval-mode identity (no RNG mask).
    x = x_ref[...].astype(bf16)              # f32 HBM stream, cast on-chip
    trig = trig_ref[...]                     # timestep [cos|sin] features

    # enc1: concat([x, emb]) replaced by two accumulated dots (emb_layer folded).
    e1 = act(dot(x, w1x) + dot(trig, w1e) + b1[...])        # (N, 64)
    e2 = act(dot(e1, w2) + b2[...])                         # (N, 128)
    e3 = act(dot(e2, w3) + b3[...])                         # (N, 256)
    d3 = act(dot(e3, wd3) + bd3[...])                       # (N, 128)
    # Decoder skip concats -> split accumulated dots (no lane-concat copies).
    d2 = act(dot(d3, wd2a) + dot(e2, wd2b) + bd2[...])      # (N, 64)
    d1 = dot(d2, wd1a) + dot(e1, wd1b) + bd1[...]           # (N, out_pad) f32
    # Lane-dense bf16 slab: unmasked vst, half the HBM write bytes of f32.
    out_ref[...] = d1.astype(bf16)


# --------------------------------- wrapper -----------------------------------

def _choose_tile_n(n):
    """Largest batch tile <= MAX_TILE_N that keeps >=2 grid steps when possible
    (so v7x's two TensorCores both get work) with minimal row padding."""
    steps = max(2, pl.cdiv(n, MAX_TILE_N))
    tile = max(8, pl.cdiv(pl.cdiv(n, steps), 8) * 8)      # multiple of 8 sublanes
    return tile


@functools.partial(jax.jit, static_argnums=(3, 4))
def unet_forward(ops, x, timesteps, emb_size, out_dim0):
    """Forward pass of UNet (2-D x, time_type='cat', norm=False, dropout eval)."""
    n, in_dim = x.shape
    out_pad = ops[-1].shape[-1]
    half = emb_size // 2

    tile_n = _choose_tile_n(n)
    n_pad = pl.cdiv(n, tile_n) * tile_n

    # Tiny (N, emb) timestep feature build — the only wrapper-side pass.
    freqs = jnp.exp(
        -math.log(10000.0) * jnp.arange(half, dtype=jnp.float32) / half
    )
    args = timesteps.astype(jnp.float32)[:, None] * freqs[None, :]
    trig = jnp.concatenate(
        [jnp.cos(args), jnp.sin(args)], axis=-1
    ).astype(jnp.bfloat16)                                # (n, 2*half)

    x32 = x.astype(jnp.float32)
    if n_pad != n:
        x32 = jnp.pad(x32, ((0, n_pad - n), (0, 0)))
        trig = jnp.pad(trig, ((0, n_pad - n), (0, 0)))

    batched = lambda d: pl.BlockSpec((tile_n, d), lambda i: (i, 0))
    resident = lambda a: pl.BlockSpec(a.shape, lambda i: (0, 0))

    out = pl.pallas_call(
        _unet_kernel,
        out_shape=jax.ShapeDtypeStruct((n_pad, out_pad), jnp.bfloat16),
        grid=(n_pad // tile_n,),
        in_specs=[batched(in_dim), batched(2 * half)] + [resident(a) for a in ops],
        out_specs=batched(out_pad),
        compiler_params=pltpu.CompilerParams(
            dimension_semantics=("parallel",)),
    )(x32, trig, *ops)

    # Trim the padded rows / lanes; tiny fused slice+convert pass.
    return out[:n, :out_dim0].astype(jnp.float32)


# -------------------------- pure-JAX reference check --------------------------

def unet_reference(params, x, timesteps, emb_size):
    time_emb = timestep_embedding(timesteps, emb_size)
    lin = lambda name, v: v @ jnp.transpose(params[name][0]) + params[name][1]
    emb = lin("emb", time_emb)
    h = jnp.concatenate([x, emb], axis=-1)
    e1 = jax.nn.relu(lin("enc1", h))
    e2 = jax.nn.relu(lin("enc2", e1))
    e3 = jax.nn.relu(lin("enc3", e2))
    d3 = jax.nn.relu(lin("dec3", e3))
    d2 = jax.nn.relu(lin("dec2", jnp.concatenate([d3, e2], axis=-1)))
    d1 = lin("dec1", jnp.concatenate([d2, e1], axis=-1))
    return d1


# ----------------------------------- main ------------------------------------

if __name__ == "__main__":
    # Shapes consistent with the module: in_dims=[32], out_dims=[32],
    # emb_size=16; batch N=256 so the 2-step (parallel) batch grid is exercised.
    in_dims, out_dims, emb_size = [32], [32], 16
    n = 256

    key = jax.random.PRNGKey(0)
    k_params, k_x = jax.random.split(key)
    params = init_unet_params(k_params, in_dims[0], out_dims[0], emb_size)
    ops = prepare_unet_operands(params, in_dims[0], out_dims[0], emb_size)

    x = jax.random.normal(k_x, (n, in_dims[0]), dtype=jnp.float32)
    timesteps = jnp.arange(n, dtype=jnp.float32)

    out = unet_forward(ops, x, timesteps, emb_size, out_dims[0])
    out = jax.block_until_ready(out)

    ref = unet_reference(params, x, timesteps, emb_size)
    assert out.shape == (n, out_dims[0])
    # bf16 weights/activations/output vs f32 reference -> relaxed tolerance.
    err = float(jnp.max(jnp.abs(out - ref)))
    assert jnp.allclose(out, ref, atol=5e-2, rtol=5e-2), (
        f"mismatch vs reference; max abs err = {err:.4f}")

    print("KERNEL_OK")
</pallas_src>

<mosaic_0001>
module attributes {stable_mosaic.version = 11 : i64} {
  func.func @_unet_kernel(%arg0: i32, %arg1: memref<128x32xf32, #tpu.memory_space<vmem>>, %arg2: memref<128x16xbf16, #tpu.memory_space<vmem>>, %arg3: memref<32x64xbf16, #tpu.memory_space<vmem>>, %arg4: memref<16x64xbf16, #tpu.memory_space<vmem>>, %arg5: memref<1x64xf32, #tpu.memory_space<vmem>>, %arg6: memref<64x128xbf16, #tpu.memory_space<vmem>>, %arg7: memref<1x128xf32, #tpu.memory_space<vmem>>, %arg8: memref<128x256xbf16, #tpu.memory_space<vmem>>, %arg9: memref<1x256xf32, #tpu.memory_space<vmem>>, %arg10: memref<256x128xbf16, #tpu.memory_space<vmem>>, %arg11: memref<1x128xf32, #tpu.memory_space<vmem>>, %arg12: memref<128x64xbf16, #tpu.memory_space<vmem>>, %arg13: memref<128x64xbf16, #tpu.memory_space<vmem>>, %arg14: memref<1x64xf32, #tpu.memory_space<vmem>>, %arg15: memref<64x128xbf16, #tpu.memory_space<vmem>>, %arg16: memref<64x128xbf16, #tpu.memory_space<vmem>>, %arg17: memref<1x128xf32, #tpu.memory_space<vmem>>, %arg18: memref<128x128xbf16, #tpu.memory_space<vmem>>) attributes {dimension_semantics = [#tpu.dimension_semantics<parallel>], iteration_bounds = array<i64: 2>, scalar_prefetch = 0 : i64, scratch_operands = 0 : i64, tpu.core_type = #tpu.core_type<tc>, window_params = [{transform_indices = @transform_0, window_bounds = array<i64: 128, 32>}, {transform_indices = @transform_1, window_bounds = array<i64: 128, 16>}, {pipeline_mode = #tpu.pipeline_mode<synchronous>, transform_indices = @transform_2, window_bounds = array<i64: 32, 64>}, {pipeline_mode = #tpu.pipeline_mode<synchronous>, transform_indices = @transform_3, window_bounds = array<i64: 16, 64>}, {pipeline_mode = #tpu.pipeline_mode<synchronous>, transform_indices = @transform_4, window_bounds = array<i64: 1, 64>}, {pipeline_mode = #tpu.pipeline_mode<synchronous>, transform_indices = @transform_5, window_bounds = array<i64: 64, 128>}, {pipeline_mode = #tpu.pipeline_mode<synchronous>, transform_indices = @transform_6, window_bounds = array<i64: 1, 128>}, {pipeline_mode = #tpu.pipeline_mode<synchronous>, transform_indices = @transform_7, window_bounds = array<i64: 128, 256>}, {pipeline_mode = #tpu.pipeline_mode<synchronous>, transform_indices = @transform_8, window_bounds = array<i64: 1, 256>}, {pipeline_mode = #tpu.pipeline_mode<synchronous>, transform_indices = @transform_9, window_bounds = array<i64: 256, 128>}, {pipeline_mode = #tpu.pipeline_mode<synchronous>, transform_indices = @transform_10, window_bounds = array<i64: 1, 128>}, {pipeline_mode = #tpu.pipeline_mode<synchronous>, transform_indices = @transform_11, window_bounds = array<i64: 128, 64>}, {pipeline_mode = #tpu.pipeline_mode<synchronous>, transform_indices = @transform_12, window_bounds = array<i64: 128, 64>}, {pipeline_mode = #tpu.pipeline_mode<synchronous>, transform_indices = @transform_13, window_bounds = array<i64: 1, 64>}, {pipeline_mode = #tpu.pipeline_mode<synchronous>, transform_indices = @transform_14, window_bounds = array<i64: 64, 128>}, {pipeline_mode = #tpu.pipeline_mode<synchronous>, transform_indices = @transform_15, window_bounds = array<i64: 64, 128>}, {pipeline_mode = #tpu.pipeline_mode<synchronous>, transform_indices = @transform_16, window_bounds = array<i64: 1, 128>}, {transform_indices = @transform_17, window_bounds = array<i64: 128, 128>}]} {
    %c0 = arith.constant 0 : index
    %c0_0 = arith.constant 0 : index
    %0 = vector.load %arg1[%c0, %c0_0] : memref<128x32xf32, #tpu.memory_space<vmem>>, vector<128x32xf32>
    %1 = arith.truncf %0 : vector<128x32xf32> to vector<128x32xbf16>
    %c0_1 = arith.constant 0 : index
    %c0_2 = arith.constant 0 : index
    %2 = vector.load %arg2[%c0_1, %c0_2] : memref<128x16xbf16, #tpu.memory_space<vmem>>, vector<128x16xbf16>
    %c0_3 = arith.constant 0 : index
    %c0_4 = arith.constant 0 : index
    %3 = vector.load %arg3[%c0_3, %c0_4] : memref<32x64xbf16, #tpu.memory_space<vmem>>, vector<32x64xbf16>
    %cst = arith.constant dense<0.000000e+00> : vector<128x64xf32>
    %4 = tpu.matmul %1, %3, %cst {dimension_numbers = #tpu.dot_dimension_numbers<[1], [0], [0], [1], [0, 0, 1, 1], [], []>} : vector<128x32xbf16>, vector<32x64xbf16>, vector<128x64xf32> -> vector<128x64xf32>
    %c0_5 = arith.constant 0 : index
    %c0_6 = arith.constant 0 : index
    %5 = vector.load %arg4[%c0_5, %c0_6] : memref<16x64xbf16, #tpu.memory_space<vmem>>, vector<16x64xbf16>
    %cst_7 = arith.constant dense<0.000000e+00> : vector<128x64xf32>
    %6 = tpu.matmul %2, %5, %cst_7 {dimension_numbers = #tpu.dot_dimension_numbers<[1], [0], [0], [1], [0, 0, 1, 1], [], []>} : vector<128x16xbf16>, vector<16x64xbf16>, vector<128x64xf32> -> vector<128x64xf32>
    %7 = arith.addf %4, %6 : vector<128x64xf32>
    %c0_8 = arith.constant 0 : index
    %c0_9 = arith.constant 0 : index
    %8 = vector.load %arg5[%c0_8, %c0_9] : memref<1x64xf32, #tpu.memory_space<vmem>>, vector<1x64xf32>
    %9 = vector.broadcast %8 : vector<1x64xf32> to vector<128x64xf32>
    %10 = arith.addf %7, %9 : vector<128x64xf32>
    %cst_10 = arith.constant 0.000000e+00 : f32
    %11 = vector.broadcast %cst_10 : f32 to vector<128x64xf32>
    %12 = arith.maximumf %10, %11 : vector<128x64xf32>
    %13 = arith.truncf %12 : vector<128x64xf32> to vector<128x64xbf16>
    %c0_11 = arith.constant 0 : index
    %c0_12 = arith.constant 0 : index
    %14 = vector.load %arg6[%c0_11, %c0_12] : memref<64x128xbf16, #tpu.memory_space<vmem>>, vector<64x128xbf16>
    %cst_13 = arith.constant dense<0.000000e+00> : vector<128x128xf32>
    %15 = tpu.matmul %13, %14, %cst_13 {dimension_numbers = #tpu.dot_dimension_numbers<[1], [0], [0], [1], [0, 0, 1, 1], [], []>} : vector<128x64xbf16>, vector<64x128xbf16>, vector<128x128xf32> -> vector<128x128xf32>
    %c0_14 = arith.constant 0 : index
    %c0_15 = arith.constant 0 : index
    %16 = vector.load %arg7[%c0_14, %c0_15] : memref<1x128xf32, #tpu.memory_space<vmem>>, vector<1x128xf32>
    %17 = vector.broadcast %16 : vector<1x128xf32> to vector<128x128xf32>
    %18 = arith.addf %15, %17 : vector<128x128xf32>
    %cst_16 = arith.constant 0.000000e+00 : f32
    %19 = vector.broadcast %cst_16 : f32 to vector<128x128xf32>
    %20 = arith.maximumf %18, %19 : vector<128x128xf32>
    %21 = arith.truncf %20 : vector<128x128xf32> to vector<128x128xbf16>
    %c0_17 = arith.constant 0 : index
    %c0_18 = arith.constant 0 : index
    %22 = vector.load %arg8[%c0_17, %c0_18] : memref<128x256xbf16, #tpu.memory_space<vmem>>, vector<128x256xbf16>
    %cst_19 = arith.constant dense<0.000000e+00> : vector<128x256xf32>
    %23 = tpu.matmul %21, %22, %cst_19 {dimension_numbers = #tpu.dot_dimension_numbers<[1], [0], [0], [1], [0, 0, 1, 1], [], []>} : vector<128x128xbf16>, vector<128x256xbf16>, vector<128x256xf32> -> vector<128x256xf32>
    %c0_20 = arith.constant 0 : index
    %c0_21 = arith.constant 0 : index
    %24 = vector.load %arg9[%c0_20, %c0_21] : memref<1x256xf32, #tpu.memory_space<vmem>>, vector<1x256xf32>
    %25 = vector.broadcast %24 : vector<1x256xf32> to vector<128x256xf32>
    %26 = arith.addf %23, %25 : vector<128x256xf32>
    %cst_22 = arith.constant 0.000000e+00 : f32
    %27 = vector.broadcast %cst_22 : f32 to vector<128x256xf32>
    %28 = arith.maximumf %26, %27 : vector<128x256xf32>
    %29 = arith.truncf %28 : vector<128x256xf32> to vector<128x256xbf16>
    %c0_23 = arith.constant 0 : index
    %c0_24 = arith.constant 0 : index
    %30 = vector.load %arg10[%c0_23, %c0_24] : memref<256x128xbf16, #tpu.memory_space<vmem>>, vector<256x128xbf16>
    %cst_25 = arith.constant dense<0.000000e+00> : vector<128x128xf32>
    %31 = tpu.matmul %29, %30, %cst_25 {dimension_numbers = #tpu.dot_dimension_numbers<[1], [0], [0], [1], [0, 0, 1, 1], [], []>} : vector<128x256xbf16>, vector<256x128xbf16>, vector<128x128xf32> -> vector<128x128xf32>
    %c0_26 = arith.constant 0 : index
    %c0_27 = arith.constant 0 : index
    %32 = vector.load %arg11[%c0_26, %c0_27] : memref<1x128xf32, #tpu.memory_space<vmem>>, vector<1x128xf32>
    %33 = vector.broadcast %32 : vector<1x128xf32> to vector<128x128xf32>
    %34 = arith.addf %31, %33 : vector<128x128xf32>
    %cst_28 = arith.constant 0.000000e+00 : f32
    %35 = vector.broadcast %cst_28 : f32 to vector<128x128xf32>
    %36 = arith.maximumf %34, %35 : vector<128x128xf32>
    %37 = arith.truncf %36 : vector<128x128xf32> to vector<128x128xbf16>
    %c0_29 = arith.constant 0 : index
    %c0_30 = arith.constant 0 : index
    %38 = vector.load %arg12[%c0_29, %c0_30] : memref<128x64xbf16, #tpu.memory_space<vmem>>, vector<128x64xbf16>
    %cst_31 = arith.constant dense<0.000000e+00> : vector<128x64xf32>
    %39 = tpu.matmul %37, %38, %cst_31 {dimension_numbers = #tpu.dot_dimension_numbers<[1], [0], [0], [1], [0, 0, 1, 1], [], []>} : vector<128x128xbf16>, vector<128x64xbf16>, vector<128x64xf32> -> vector<128x64xf32>
    %c0_32 = arith.constant 0 : index
    %c0_33 = arith.constant 0 : index
    %40 = vector.load %arg13[%c0_32, %c0_33] : memref<128x64xbf16, #tpu.memory_space<vmem>>, vector<128x64xbf16>
    %cst_34 = arith.constant dense<0.000000e+00> : vector<128x64xf32>
    %41 = tpu.matmul %21, %40, %cst_34 {dimension_numbers = #tpu.dot_dimension_numbers<[1], [0], [0], [1], [0, 0, 1, 1], [], []>} : vector<128x128xbf16>, vector<128x64xbf16>, vector<128x64xf32> -> vector<128x64xf32>
    %42 = arith.addf %39, %41 : vector<128x64xf32>
    %c0_35 = arith.constant 0 : index
    %c0_36 = arith.constant 0 : index
    %43 = vector.load %arg14[%c0_35, %c0_36] : memref<1x64xf32, #tpu.memory_space<vmem>>, vector<1x64xf32>
    %44 = vector.broadcast %43 : vector<1x64xf32> to vector<128x64xf32>
    %45 = arith.addf %42, %44 : vector<128x64xf32>
    %cst_37 = arith.constant 0.000000e+00 : f32
    %46 = vector.broadcast %cst_37 : f32 to vector<128x64xf32>
    %47 = arith.maximumf %45, %46 : vector<128x64xf32>
    %48 = arith.truncf %47 : vector<128x64xf32> to vector<128x64xbf16>
    %c0_38 = arith.constant 0 : index
    %c0_39 = arith.constant 0 : index
    %49 = vector.load %arg15[%c0_38, %c0_39] : memref<64x128xbf16, #tpu.memory_space<vmem>>, vector<64x128xbf16>
    %cst_40 = arith.constant dense<0.000000e+00> : vector<128x128xf32>
    %50 = tpu.matmul %48, %49, %cst_40 {dimension_numbers = #tpu.dot_dimension_numbers<[1], [0], [0], [1], [0, 0, 1, 1], [], []>} : vector<128x64xbf16>, vector<64x128xbf16>, vector<128x128xf32> -> vector<128x128xf32>
    %c0_41 = arith.constant 0 : index
    %c0_42 = arith.constant 0 : index
    %51 = vector.load %arg16[%c0_41, %c0_42] : memref<64x128xbf16, #tpu.memory_space<vmem>>, vector<64x128xbf16>
    %cst_43 = arith.constant dense<0.000000e+00> : vector<128x128xf32>
    %52 = tpu.matmul %13, %51, %cst_43 {dimension_numbers = #tpu.dot_dimension_numbers<[1], [0], [0], [1], [0, 0, 1, 1], [], []>} : vector<128x64xbf16>, vector<64x128xbf16>, vector<128x128xf32> -> vector<128x128xf32>
    %53 = arith.addf %50, %52 : vector<128x128xf32>
    %c0_44 = arith.constant 0 : index
    %c0_45 = arith.constant 0 : index
    %54 = vector.load %arg17[%c0_44, %c0_45] : memref<1x128xf32, #tpu.memory_space<vmem>>, vector<1x128xf32>
    %55 = vector.broadcast %54 : vector<1x128xf32> to vector<128x128xf32>
    %56 = arith.addf %53, %55 : vector<128x128xf32>
    %57 = arith.truncf %56 : vector<128x128xf32> to vector<128x128xbf16>
    %c0_46 = arith.constant 0 : index
    %c0_47 = arith.constant 0 : index
    %58 = vector.load %arg18[%c0_46, %c0_47] : memref<128x128xbf16, #tpu.memory_space<vmem>>, vector<128x128xbf16>
    tpu.vector_store %arg18[%c0_46, %c0_47], %57 {strides = array<i32>} : memref<128x128xbf16, #tpu.memory_space<vmem>>, vector<128x128xbf16>,
    return
  }
  func.func @transform_0(%arg0: i32) -> (i32, i32) {
    %c0_i32 = arith.constant 0 : i32
    %c0_i32_0 = arith.constant 0 : i32
    return %arg0, %c0_i32 : i32, i32
  }
  func.func @transform_1(%arg0: i32) -> (i32, i32) {
    %c0_i32 = arith.constant 0 : i32
    %c0_i32_0 = arith.constant 0 : i32
    return %arg0, %c0_i32 : i32, i32
  }
  func.func @transform_2(%arg0: i32) -> (i32, i32) {
    %c0_i32 = arith.constant 0 : i32
    %c0_i32_0 = arith.constant 0 : i32
    %c0_i32_1 = arith.constant 0 : i32
    return %c0_i32, %c0_i32_0 : i32, i32
  }
  func.func @transform_3(%arg0: i32) -> (i32, i32) {
    %c0_i32 = arith.constant 0 : i32
    %c0_i32_0 = arith.constant 0 : i32
    %c0_i32_1 = arith.constant 0 : i32
    return %c0_i32, %c0_i32_0 : i32, i32
  }
  func.func @transform_4(%arg0: i32) -> (i32, i32) {
    %c0_i32 = arith.constant 0 : i32
    %c0_i32_0 = arith.constant 0 : i32
    %c0_i32_1 = arith.constant 0 : i32
    return %c0_i32, %c0_i32_0 : i32, i32
  }
  func.func @transform_5(%arg0: i32) -> (i32, i32) {
    %c0_i32 = arith.constant 0 : i32
    %c0_i32_0 = arith.constant 0 : i32
    %c0_i32_1 = arith.constant 0 : i32
    return %c0_i32, %c0_i32_0 : i32, i32
  }
  func.func @transform_6(%arg0: i32) -> (i32, i32) {
    %c0_i32 = arith.constant 0 : i32
    %c0_i32_0 = arith.constant 0 : i32
    %c0_i32_1 = arith.constant 0 : i32
    return %c0_i32, %c0_i32_0 : i32, i32
  }
  func.func @transform_7(%arg0: i32) -> (i32, i32) {
    %c0_i32 = arith.constant 0 : i32
    %c0_i32_0 = arith.constant 0 : i32
    %c0_i32_1 = arith.constant 0 : i32
    return %c0_i32, %c0_i32_0 : i32, i32
  }
  func.func @transform_8(%arg0: i32) -> (i32, i32) {
    %c0_i32 = arith.constant 0 : i32
    %c0_i32_0 = arith.constant 0 : i32
    %c0_i32_1 = arith.constant 0 : i32
    return %c0_i32, %c0_i32_0 : i32, i32
  }
  func.func @transform_9(%arg0: i32) -> (i32, i32) {
    %c0_i32 = arith.constant 0 : i32
    %c0_i32_0 = arith.constant 0 : i32
    %c0_i32_1 = arith.constant 0 : i32
    return %c0_i32, %c0_i32_0 : i32, i32
  }
  func.func @transform_10(%arg0: i32) -> (i32, i32) {
    %c0_i32 = arith.constant 0 : i32
    %c0_i32_0 = arith.constant 0 : i32
    %c0_i32_1 = arith.constant 0 : i32
    return %c0_i32, %c0_i32_0 : i32, i32
  }
  func.func @transform_11(%arg0: i32) -> (i32, i32) {
    %c0_i32 = arith.constant 0 : i32
    %c0_i32_0 = arith.constant 0 : i32
    %c0_i32_1 = arith.constant 0 : i32
    return %c0_i32, %c0_i32_0 : i32, i32
  }
  func.func @transform_12(%arg0: i32) -> (i32, i32) {
    %c0_i32 = arith.constant 0 : i32
    %c0_i32_0 = arith.constant 0 : i32
    %c0_i32_1 = arith.constant 0 : i32
    return %c0_i32, %c0_i32_0 : i32, i32
  }
  func.func @transform_13(%arg0: i32) -> (i32, i32) {
    %c0_i32 = arith.constant 0 : i32
    %c0_i32_0 = arith.constant 0 : i32
    %c0_i32_1 = arith.constant 0 : i32
    return %c0_i32, %c0_i32_0 : i32, i32
  }
  func.func @transform_14(%arg0: i32) -> (i32, i32) {
    %c0_i32 = arith.constant 0 : i32
    %c0_i32_0 = arith.constant 0 : i32
    %c0_i32_1 = arith.constant 0 : i32
    return %c0_i32, %c0_i32_0 : i32, i32
  }
  func.func @transform_15(%arg0: i32) -> (i32, i32) {
    %c0_i32 = arith.constant 0 : i32
    %c0_i32_0 = arith.constant 0 : i32
    %c0_i32_1 = arith.constant 0 : i32
    return %c0_i32, %c0_i32_0 : i32, i32
  }
  func.func @transform_16(%arg0: i32) -> (i32, i32) {
    %c0_i32 = arith.constant 0 : i32
    %c0_i32_0 = arith.constant 0 : i32
    %c0_i32_1 = arith.constant 0 : i32
    return %c0_i32, %c0_i32_0 : i32, i32
  }
  func.func @transform_17(%arg0: i32) -> (i32, i32) {
    %c0_i32 = arith.constant 0 : i32
    %c0_i32_0 = arith.constant 0 : i32
    return %arg0, %c0_i32 : i32, i32
  }
}

</mosaic_0001>

<bundles_post_ra>
// kernel: unet_forward.1
= control target key start
LH: loop header
LB: loop body
LE: loop exit
PB: predicated region body
PF: predicated region fallthrough
CT: control target
= control target key end

     0   :  { %s3272_s24 = smov 0   ;;  %s3739_s0 = inlined_call_operand.vmem [shape: f32[256,32], index: 0, kind: input, shape index: {}]   ;;  %s3740_s1 = inlined_call_operand.vmem [shape: bf16[256,16], index: 1, kind: input, shape index: {}]   ;;  %s3741_s2 = inlined_call_operand.vmem [shape: bf16[32,64], index: 2, kind: input, shape index: {}]   ;;  %s3742_s3 = inlined_call_operand.vmem [shape: bf16[16,64], index: 3, kind: input, shape index: {}]   ;;  %s3743_s4 = inlined_call_operand.vmem [shape: f32[1,64], index: 4, kind: input, shape index: {}]   ;;  %s3744_s5 = inlined_call_operand.vmem [shape: bf16[64,128], index: 5, kind: input, shape index: {}]   ;;  %s3745_s6 = inlined_call_operand.vmem [shape: f32[1,128], index: 6, kind: input, shape index: {}]   ;;  %s3746_s7 = inlined_call_operand.vmem [shape: bf16[128,256], index: 7, kind: input, shape index: {}]   ;;  %s3747_s8 = inlined_call_operand.vmem [shape: f32[1,256], index: 8, kind: input, shape index: {}]   ;;  %s3748_s9 = inlined_call_operand.vmem [shape: bf16[256,128], index: 9, kind: input, shape index: {}]   ;;  %s3749_s10 = inlined_call_operand.vmem [shape: f32[1,128], index: 10, kind: input, shape index: {}]   ;;  %s3750_s11 = inlined_call_operand.vmem [shape: bf16[128,64], index: 11, kind: input, shape index: {}]   ;;  %s3751_s12 = inlined_call_operand.vmem [shape: bf16[128,64], index: 12, kind: input, shape index: {}]   ;;  %s3752_s13 = inlined_call_operand.vmem [shape: f32[1,64], index: 13, kind: input, shape index: {}]   ;;  %s3753_s14 = inlined_call_operand.vmem [shape: bf16[64,128], index: 14, kind: input, shape index: {}]   ;;  %s3754_s15 = inlined_call_operand.vmem [shape: bf16[64,128], index: 15, kind: input, shape index: {}]   ;;  %s3755_s16 = inlined_call_operand.vmem [shape: f32[1,128], index: 16, kind: input, shape index: {}]   ;;  %s3756_s17 = inlined_call_operand.vmem [shape: bf16[256,128], index: 17, kind: output, shape index: {}]  }
   0x1   :  { %3757 = sst [smem:[#allocation2_spill]] %s3739_s0 }
   0x2   :  { %3758 = sst [smem:[#allocation3_spill]] %s3740_s1 }
   0x3 LB: > { %s2502_s25 = sadd.s32 4294967295, %s3179_s24   ;;  %p2506_p0 = scmp.ge.s32.totalorder %s3179_s24, 1  ;;  %s3179_s24 = sphi %s3272_s24, %s27_s24  }
   0x4   : > { %p499_p1 = scmp.lt.s32.totalorder %s3179_s24, 3 }
   0x6   : > { %p500_p2 = pnand %p2506_p0, %p499_p1 }
   0x7   : > { %v3094_v0 = vld [vmem:[%s3742_s3] sm:$0xff] (!%p500_p2)   ;;  %s2507_s28 = sshll.u32 (!%p500_p2), %s2502_s25, 4  ;;  %vm667_vm0 = vcmask (!%p500_p2), 130048   ;;  %s3759_s22 = sld [smem:[#allocation3_spill]] (!%p500_p2)  ;;  %v3099_v3 = vld [vmem:[%s3741_s2 + $0x8] sm:$0xff] (!%p500_p2)   ;;  %vm801_vm1 = vcmask (!%p500_p2), 261120  }
   0x8   : > { %503 = sbr.rel (%p500_p2) target bundleno = 1422 (0x58e), region = 88  ;;  %p557_p3 = scmp.lt.s32.totalorder (!%p500_p2), %s2507_s28, 31  ;;  %2861 = vmatprep.subr.bf16.mxu0 (!%p500_p2), %v3094_v0  ;;  %v3096_v1 = vld [vmem:[%s3741_s2] sm:$0xff] (!%p500_p2)   ;;  %3035 = vmatprep.subr.bf16.mxu1 (!%p500_p2), %v3094_v0  ;;  %v3106_v13 = vld [vmem:[%s3744_s5 + $0x8] sm:$0xff] (!%p500_p2)   ;;  %v3107_v37 = vld [vmem:[%s3744_s5 + $0x10] sm:$0xff] (!%p500_p2)   ;;  %vm1009_vm2 = vcmask (!%p500_p2), 523264  }
   0x9   : > { %2862 = vmatpush3.bf16.msra.mxu0 (!%p500_p2), %v3094_v0  ;;  %3036 = vmatpush3.bf16.msra.mxu1 (!%p500_p2), %v3094_v0  ;;  %v3105_v2 = vld [vmem:[%s3744_s5] sm:$0xff] (!%p500_p2)   ;;  %s3760_s0 = sld [smem:[#allocation2_spill]] (!%p500_p2)  ;;  %v3108_v38 = vld [vmem:[%s3744_s5 + $0x18] sm:$0xff] (!%p500_p2)  }
   0xa   : > { %2879 = vmatprep.subr.bf16.mxu0 (!%p500_p2), %v3096_v1  ;;  %2899 = vmatprep.subr.bf16.mxu1 (!%p500_p2), %v3105_v2  ;;  %v3111_v39 = vld [vmem:[%s3746_s7 + $0x4] ss:$8 sps:$4 sm:$0xff] (!%p500_p2)   ;;  %v3363_v44 = vld [vmem:[%s3743_s4] ss:$0 sm:$0xff] (!%p500_p2) }
   0xb   : > { %v3109_v0 = vld [vmem:[%s3746_s7] ss:$8 sps:$4 sm:$0xff] (!%p500_p2)  }
   0xf   : > { %s3762_s28 = smov (!%p557_p3, %s2507_s28), 31 }
  0x10   : > { %s2508_s19 = sshll.u32 %s3762_s28, 3  ;;  %s2510_s1 = sshll.u32 %s3762_s28, 2 }
  0x11   : > { %s3298_s23 = scalar_lea.vmem %s3759_s22, %s2510_s1  ;;  %s3308_s30 = scalar_lea.vmem %s3760_s0, %s2508_s19 }
  0x12   : > { %v3095_v4 = vld [vmem:[%s3298_s23] sm:$0xff]   ;;  %v3097_v5 = vld [vmem:[%s3298_s23 + $0x8] sm:$0xff]   ;;  %v3098_v6 = vld [vmem:[%s3298_s23 + $0x10] sm:$0xff]   ;;  %s3726_s18 = scalar_lea.vmem %s3756_s17, %s2510_s1 }
  0x13   : > { %2863 = vmatprep.mubr.msk.bf16.mxu0 %vm667_vm0, %v3095_v4  ;;  %v575_v7 = vld [vmem:[%s3308_s30] sm:$0xff]  ;;  %v576_v8 = vld [vmem:[%s3308_s30 + $0x8] sm:$0xff]  ;;  %v3100_v9 = vld [vmem:[%s3298_s23 + $0x18] sm:$0xff]  }
  0x14   : > { %2864 = vmatmul.mubr.msk.bf16.vlgmr.msra.gmra.mrb[0].mxu0 %vm667_vm0, %v3097_v5  ;;  %v3101_v10 = vld [vmem:[%s3298_s23 + $0x20] sm:$0xff]   ;;  %v591_v11 = vpack.c.bf16 %v576_v8, %v575_v7  ;;  %v3102_v12 = vld [vmem:[%s3298_s23 + $0x28] sm:$0xff]   ;;  %v3103_v14 = vld [vmem:[%s3298_s23 + $0x30] sm:$0xff]  }
  0x15   : > { %2880 = vmatpush3.bf16.msra.mxu0 %v3096_v1  ;;  %2867 = vmatprep.mubr.msk.bf16.mxu0 %vm667_vm0, %v3098_v6  ;;  %v577_v15 = vld [vmem:[%s3308_s30 + $0x10] sm:$0xff]  ;;  %v578_v16 = vld [vmem:[%s3308_s30 + $0x18] sm:$0xff]  ;;  %v579_v17 = vld [vmem:[%s3308_s30 + $0x20] sm:$0xff] }
  0x16   : > { %2881 = vmatprep.subr.bf16.mxu0 %v3099_v3  ;;  %2871 = vmatprep.mubr.msk.bf16.mxu1 %vm667_vm0, %v3101_v10  ;;  %v580_v18 = vld [vmem:[%s3308_s30 + $0x28] sm:$0xff]  ;;  %v3104_v19 = vld [vmem:[%s3298_s23 + $0x38] sm:$0xff]   ;;  %v592_v20 = vpack.c.bf16 %v578_v16, %v577_v15  ;;  %v581_v22 = vld [vmem:[%s3308_s30 + $0x30] sm:$0xff] }
  0x17   : > { %2872 = vmatmul.mubr.msk.bf16.vlgmr.msra.gmra.mrb[0].mxu1 %vm667_vm0, %v3102_v12  ;;  %v593_v21 = vpack.c.bf16 %v580_v18, %v579_v17  ;;  %v582_v23 = vld [vmem:[%s3308_s30 + $0x38] sm:$0xff]  ;;  %v583_v24 = vld [vmem:[%s3308_s30 + $0x40] sm:$0xff]  ;;  %v584_v25 = vld [vmem:[%s3308_s30 + $0x48] sm:$0xff] }
  0x18   : > { %2875 = vmatprep.mubr.msk.bf16.mxu1 %vm667_vm0, %v3103_v14  ;;  %2900 = vmatpush3.bf16.msra.mxu1 %v3105_v2  ;;  %v594_v26 = vpack.c.bf16 %v582_v23, %v581_v22  ;;  %v595_v27 = vpack.c.bf16 %v584_v25, %v583_v24  ;;  %v585_v28 = vld [vmem:[%s3308_s30 + $0x50] sm:$0xff]  ;;  %v586_v29 = vld [vmem:[%s3308_s30 + $0x58] sm:$0xff]  ;;  %v587_v30 = vld [vmem:[%s3308_s30 + $0x60] sm:$0xff] }
  0x19   : > { %2882 = vmatpush3.bf16.msra.mxu0 %v3099_v3  ;;  %2901 = vmatprep.subr.bf16.mxu1 %v3106_v13  ;;  %v588_v31 = vld [vmem:[%s3308_s30 + $0x68] sm:$0xff]  ;;  %v596_v32 = vpack.c.bf16 %v586_v29, %v585_v28  ;;  %v589_v34 = vld [vmem:[%s3308_s30 + $0x70] sm:$0xff]  ;;  %v590_v35 = vld [vmem:[%s3308_s30 + $0x78] sm:$0xff] }
  0x1a   : > { %v597_v33 = vpack.c.bf16 %v588_v31, %v587_v30  ;;  %v598_v36 = vpack.c.bf16 %v590_v35, %v589_v34  ;;  %v3114_v3 = vld [vmem:[%s3746_s7 + $0x14] ss:$8 sps:$4 sm:$0xff]   ;;  %v3117_v12 = vld [vmem:[%s3746_s7 + $0x24] ss:$8 sps:$4 sm:$0xff]   ;;  %v3115_v18 = vld [vmem:[%s3746_s7 + $0x20] ss:$8 sps:$4 sm:$0xff]  }
  0x1b   : > { %v3118_v29 = vld [vmem:[%s3746_s7 + $0x30] ss:$8 sps:$4 sm:$0xff]  }
  0x1c   : > { %2868 = vmatmul.mubr.msk.bf16.gmra.mrb[4].mxu0 %vm667_vm0, %v3100_v9  ;;  %2902 = vmatpush3.bf16.msra.mxu1 %v3106_v13  ;;  %v3112_v9 = vld [vmem:[%s3746_s7 + $0x10] ss:$8 sps:$4 sm:$0xff]  }
  0x1d   : > { %2883 = vmatprep.mubr.msk.bf16.mxu0 %vm801_vm1, %v591_v11  ;;  %2903 = vmatprep.subr.bf16.mxu1 %v3107_v37 }
  0x1f   : > { %2876 = vmatmul.mubr.msk.bf16.gmra.mrb[4].mxu1 %vm667_vm0, %v3104_v19 }
  0x20   : > { %2904 = vmatpush3.bf16.msra.mxu1 %v3107_v37 }
  0x21   : > { %2905 = vmatprep.subr.bf16.mxu1 %v3108_v38 }
  0x24   : > { %2884 = vmatmul.mubr.msk.bf16.vlgmr.msra.gmra.mrb[0].mxu0 %vm801_vm1, %v592_v20  ;;  %2906 = vmatpush3.bf16.msra.mxu1 %v3108_v38  ;;  %v3121_v38 = vld [vmem:[%s3746_s7 + $0x40] ss:$8 sps:$4 sm:$0xff]  }
  0x25   : > { %2887 = vmatprep.mubr.msk.bf16.mxu0 %vm801_vm1, %v593_v21  ;;  %1263 = vmatprep.subr.bf16.mxu1 %v3111_v39  ;;  %v3120_v21 = vld [vmem:[%s3746_s7 + $0x34] ss:$8 sps:$4 sm:$0xff]  }
  0x2c   : > { %2888 = vmatmul.mubr.msk.bf16.gmra.mrb[4].mxu0 %vm801_vm1, %v594_v26 }
  0x2d   : > { %2891 = vmatprep.mubr.msk.bf16.mxu0 %vm801_vm1, %v595_v27 }
  0x34   : > { %2892 = vmatmul.mubr.msk.bf16.gmra.mrb[8].mxu0 %vm801_vm1, %v596_v32  ;;  %v3123_v32 = vld [vmem:[%s3746_s7 + $0x44] ss:$8 sps:$4 sm:$0xff]  }
  0x35   : > { %2895 = vmatprep.mubr.msk.bf16.mxu0 %vm801_vm1, %v597_v33 }
  0x3c   : > { %2896 = vmatmul.mubr.msk.bf16.gmra.mrb[12].mxu0 %vm801_vm1, %v598_v36 }
  0xea   : > { %v2873_v40 = vpop.f32.mrb[0].mxu1 }
  0xeb   : > { %v758_v41 = vpop.f32.mrb[1].mxu1 }
  0xec   : > { %v2874_v42 = vpop.f32.mrb[2].mxu1 }
  0xed   : > { %v761_v43 = vpop.f32.mrb[3].mxu1 }
  0xf2   : > { %v3365_v46 = vpop.f32.mrb[4].mxu1 }
  0xf3   : > { %v3368_v49 = vpop.f32.mrb[5].mxu1 }
  0xf4   : > { %v3371_v52 = vpop.f32.mrb[6].mxu1 }
  0xf5   : > { %v3374_v55 = vpop.f32.mrb[7].mxu1 }
  0xf7   : > { %v2885_v45 = vpop.f32.mrb[0].mxu0 }
  0xf8   : > { %v932_v47 = vadd.f32 %v2885_v45, %v3363_v44  ;;  %v860_v48 = vpop.f32.mrb[1].mxu0 }
  0xf9   : > { %v930_v50 = vadd.f32 %v3363_v44, %v860_v48  ;;  %v2886_v51 = vpop.f32.mrb[2].mxu0 }
  0xfa   : > { %v933_v53 = vadd.f32 %v2886_v51, %v3363_v44  ;;  %v863_v54 = vpop.f32.mrb[3].mxu0  ;;  %v948_v57 = vmax.f32 %v932_v47, 0.0 }
  0xfb   : > { %v931_v56 = vadd.f32 %v3363_v44, %v863_v54  ;;  %v946_v59 = vmax.f32 %v930_v50, 0.0  ;;  %v3124_v54 = vld [vmem:[%s3746_s7 + $0x50] ss:$8 sps:$4 sm:$0xff]  }
  0xfc   : > { %v949_v58 = vmax.f32 %v933_v53, 0.0 }
  0xfd   : > { %v947_v60 = vmax.f32 %v931_v56, 0.0 }
  0xfe   : > { %v3377_v61 = vpack.c.bf16 %v949_v58, %v948_v57 }
  0xff   : > { %v3379_v62 = vpack.c.bf16 %v947_v60, %v946_v59  ;;  %v2889_v63 = vpop.f32.mrb[4].mxu0 }
 0x100   : > { %v936_v1 = vadd.f32 %v2889_v63, %v3363_v44  ;;  %v876_v2 = vpop.f32.mrb[5].mxu0  ;;  %v3129_v63 = vld [vmem:[%s3746_s7 + $0x64] ss:$8 sps:$4 sm:$0xff]  }
 0x101   : > { %v934_v4 = vadd.f32 %v3363_v44, %v876_v2  ;;  %v2890_v5 = vpop.f32.mrb[6].mxu0  ;;  %2907 = vmatprep.mubr.msk.bf16.mxu1 %vm1009_vm2, %v3379_v62  ;;  %v3181_v2 = vmov 0  }
 0x102   : > { %v937_v6 = vadd.f32 %v2890_v5, %v3363_v44  ;;  %v879_v7 = vpop.f32.mrb[7].mxu0  ;;  %2908 = vmatmul.mubr.msk.bf16.vlgmr.msra.gmra.mrb[8].mxu1 %vm1009_vm2, %v3377_v61  ;;  %v952_v10 = vmax.f32 %v936_v1, 0.0  ;;  %v3130_v1 = vld [vmem:[%s3746_s7 + $0x70] ss:$8 sps:$4 sm:$0xff]   ;;  %v3142_v5 = vld [vmem:[%s3748_s9] sm:$0xff]  }
 0x103   : > { %v935_v8 = vadd.f32 %v3363_v44, %v879_v7  ;;  %1264 = vmatpush1.bf16.msra.mxu1 %v3109_v0  ;;  %v950_v13 = vmax.f32 %v934_v4, 0.0  ;;  %v3132_v0 = vld [vmem:[%s3746_s7 + $0x74] ss:$8 sps:$4 sm:$0xff]   ;;  %v3141_v4 = vld [vmem:[%s3748_s9 + $0x40] sm:$0xff]   ;;  %v3144_v7 = vld [vmem:[%s3748_s9 + $0x8] sm:$0xff]  }
 0x104   : > { %v953_v11 = vmax.f32 %v937_v6, 0.0  ;;  %1265 = vmatprep.subr.bf16.mxu1 %v3114_v3  ;;  %v3133_v3 = vld [vmem:[%s3751_s12] sm:$0xff]   ;;  %v3143_v6 = vld [vmem:[%s3748_s9 + $0x48] sm:$0xff]   ;;  %2741 = vmatprep.subr.bf16.mxu0 %v3141_v4 }
 0x105   : > { %v951_v14 = vmax.f32 %v935_v8, 0.0  ;;  %2742 = vmatpush3.bf16.msra.mxu0 %v3142_v5  ;;  %v3145_v8 = vld [vmem:[%s3748_s9 + $0x50] sm:$0xff]  }
 0x106   : > { %v3401_v15 = vpack.c.bf16 %v953_v11, %v952_v10  ;;  %2743 = vmatprep.subr.bf16.mxu0 %v3143_v6  ;;  %v3147_v10 = vld [vmem:[%s3748_s9 + $0x58] sm:$0xff]   ;;  %v3138_v6 = vld [vmem:[%s3751_s12 + $0x28] sm:$0xff]  }
 0x107   : > { %v3403_v16 = vpack.c.bf16 %v951_v14, %v950_v13  ;;  %v2893_v17 = vpop.f32.mrb[8].mxu0  ;;  %1266 = vmatpush1.bf16.msra.mxu1 %v3112_v9  ;;  %v3146_v9 = vld [vmem:[%s3748_s9 + $0x10] sm:$0xff]   ;;  %v3148_v11 = vld [vmem:[%s3748_s9 + $0x18] sm:$0xff]   ;;  %v3150_v13 = vld [vmem:[%s3748_s9 + $0x20] sm:$0xff]  }
 0x108   : > { %v901_v19 = vadd.f32 %v2893_v17, %v2873_v40  ;;  %v892_v20 = vpop.f32.mrb[9].mxu0  ;;  %1267 = vmatprep.subr.bf16.mxu1 %v3117_v12  ;;  %v3149_v12 = vld [vmem:[%s3748_s9 + $0x60] sm:$0xff]   ;;  %v3151_v14 = vld [vmem:[%s3748_s9 + $0x68] sm:$0xff]  }
 0x109   : > { %2911 = vmatprep.mubr.msk.bf16.mxu1 %vm1009_vm2, %v3403_v16  ;;  %v893_v22 = vadd.f32 %v892_v20, %v758_v41  ;;  %v2894_v23 = vpop.f32.mrb[10].mxu0  ;;  %2744 = vmatpush3.bf16.msra.mxu0 %v3144_v7  ;;  %v3152_v17 = vld [vmem:[%s3748_s9 + $0x28] sm:$0xff]  }
 0x10a   : > { %2912 = vmatmul.mubr.msk.bf16.gmra.mrb[12].mxu1 %vm1009_vm2, %v3401_v15  ;;  %v940_v24 = vadd.f32 %v3363_v44, %v901_v19  ;;  %v904_v25 = vadd.f32 %v2894_v23, %v2874_v42  ;;  %v895_v26 = vpop.f32.mrb[11].mxu0  ;;  %v3126_v42 = vld [vmem:[%s3746_s7 + $0x54] ss:$8 sps:$4 sm:$0xff]   ;;  %2745 = vmatprep.subr.bf16.mxu0 %v3145_v8 }
 0x10b   : > { %v938_v27 = vadd.f32 %v3363_v44, %v893_v22  ;;  %v896_v28 = vadd.f32 %v895_v26, %v761_v43  ;;  %1268 = vmatpush1.bf16.msra.mxu1 %v3115_v18  ;;  %v3513_v18 = vld [vmem:[%s3745_s6] ss:$0 sm:$0xff] }
 0x10c   : > { %v956_v30 = vmax.f32 %v940_v24, 0.0  ;;  %v941_v31 = vadd.f32 %v3363_v44, %v904_v25  ;;  %1269 = vmatprep.subr.bf16.mxu1 %v3120_v21 }
 0x10d   : > { %v954_v33 = vmax.f32 %v938_v27, 0.0  ;;  %v939_v34 = vadd.f32 %v3363_v44, %v896_v28  ;;  %2746 = vmatpush3.bf16.msra.mxu0 %v3146_v9 }
 0x10e   : > { %v957_v35 = vmax.f32 %v941_v31, 0.0  ;;  %2747 = vmatprep.subr.bf16.mxu0 %v3147_v10 }
 0x10f   : > { %v955_v36 = vmax.f32 %v939_v34, 0.0  ;;  %v2897_v37 = vpop.f32.mrb[12].mxu0  ;;  %1270 = vmatpush1.bf16.msra.mxu1 %v3118_v29  ;;  %v3134_v34 = vld [vmem:[%s3751_s12 + $0x8] sm:$0xff]  }
 0x110   : > { %v3428_v39 = vpack.c.bf16 %v957_v35, %v956_v30  ;;  %v917_v40 = vadd.f32 %v2897_v37, %v3365_v46  ;;  %v908_v41 = vpop.f32.mrb[13].mxu0  ;;  %1271 = vmatprep.subr.bf16.mxu1 %v3123_v32 }
 0x111   : > { %v3434_v43 = vpack.c.bf16 %v955_v36, %v954_v33  ;;  %v909_v45 = vadd.f32 %v908_v41, %v3368_v49  ;;  %v2898_v47 = vpop.f32.mrb[14].mxu0  ;;  %2748 = vmatpush3.bf16.msra.mxu0 %v3148_v11 }
 0x112   : > { %v944_v48 = vadd.f32 %v3363_v44, %v917_v40  ;;  %v920_v50 = vadd.f32 %v2898_v47, %v3371_v52  ;;  %v911_v51 = vpop.f32.mrb[15].mxu0  ;;  %2749 = vmatprep.subr.bf16.mxu0 %v3149_v12 }
 0x113   : > { %2915 = vmatprep.mubr.msk.bf16.mxu1 %vm1009_vm2, %v3434_v43  ;;  %v942_v46 = vadd.f32 %v3363_v44, %v909_v45  ;;  %v912_v53 = vadd.f32 %v911_v51, %v3374_v55  ;;  %1272 = vmatpush1.bf16.msra.mxu1 %v3121_v38  ;;  %v3135_v45 = vld [vmem:[%s3751_s12 + $0x10] sm:$0xff]  }
 0x114   : > { %2916 = vmatmul.mubr.msk.bf16.gmra.mrb[16].mxu1 %vm1009_vm2, %v3428_v39  ;;  %v960_v49 = vmax.f32 %v944_v48, 0.0  ;;  %v945_v56 = vadd.f32 %v3363_v44, %v920_v50  ;;  %1273 = vmatprep.subr.bf16.mxu1 %v3126_v42 }
 0x115   : > { %v958_v52 = vmax.f32 %v942_v46, 0.0  ;;  %v943_v57 = vadd.f32 %v3363_v44, %v912_v53  ;;  %v3127_v44 = vld [vmem:[%s3746_s7 + $0x60] ss:$8 sps:$4 sm:$0xff]   ;;  %2750 = vmatpush3.bf16.msra.mxu0 %v3150_v13 }
 0x116   : > { %v961_v58 = vmax.f32 %v945_v56, 0.0  ;;  %2751 = vmatprep.subr.bf16.mxu0 %v3151_v14  ;;  %v3139_v14 = vld [vmem:[%s3751_s12 + $0x30] sm:$0xff]  }
 0x117   : > { %v959_v59 = vmax.f32 %v943_v57, 0.0  ;;  %1274 = vmatpush1.bf16.msra.mxu1 %v3124_v54  ;;  %v3136_v54 = vld [vmem:[%s3751_s12 + $0x18] sm:$0xff]  }
 0x118   : > { %v3450_v60 = vpack.c.bf16 %v961_v58, %v960_v49  ;;  %1275 = vmatprep.subr.bf16.mxu1 %v3129_v63 }
 0x119   : > { %v3452_v55 = vpack.c.bf16 %v959_v59, %v958_v52  ;;  %2752 = vmatpush3.bf16.msra.mxu0 %v3152_v17  ;;  %v3137_v59 = vld [vmem:[%s3751_s12 + $0x20] sm:$0xff]  }
 0x11b   : > { %2919 = vmatprep.mubr.msk.bf16.mxu1 %vm1009_vm2, %v3452_v55  ;;  %1276 = vmatpush1.bf16.msra.mxu1 %v3127_v44 }
 0x11c   : > { %2920 = vmatmul.mubr.msk.bf16.gmra.mrb[20].mxu1 %vm1009_vm2, %v3450_v60  ;;  %1277 = vmatprep.subr.bf16.mxu1 %v3132_v0 }
 0x11d   : > { %1295 = vmatprep.mubr.bf16.mxu1 %v3181_v2 }
 0x11f   : > { %1278 = vmatpush1.bf16.msra.mxu1 %v3130_v1 }
 0x120   : > { %2923 = vmatprep.subr.bf16.mxu1 %v3133_v3 }
 0x1d5   : > { %v2909_v19 = vpop.f32.mrb[8].mxu1 }
 0x1d6   : > { %v1077_v20 = vadd.f32 %v2909_v19, %v3513_v18  ;;  %v1068_v21 = vpop.f32.mrb[9].mxu1 }
 0x1d7   : > { %v1069_v22 = vadd.f32 %v3513_v18, %v1068_v21  ;;  %v2910_v23 = vpop.f32.mrb[10].mxu1 }
 0x1d8   : > { %v1080_v24 = vadd.f32 %v2910_v23, %v3513_v18  ;;  %v1071_v25 = vpop.f32.mrb[11].mxu1  ;;  %v1133_v27 = vmax.f32 %v1077_v20, 0.0 }
 0x1d9   : > { %v1072_v26 = vadd.f32 %v3513_v18, %v1071_v25  ;;  %v1131_v29 = vmax.f32 %v1069_v22, 0.0  ;;  %v3140_v25 = vld [vmem:[%s3751_s12 + $0x38] sm:$0xff]  }
 0x1da   : > { %v1134_v28 = vmax.f32 %v1080_v24, 0.0 }
 0x1db   : > { %v1132_v30 = vmax.f32 %v1072_v26, 0.0 }
 0x1dc   : > { %v3519_v31 = vpack.c.bf16 %v1134_v28, %v1133_v27  ;;  %v3154_v28 = vld [vmem:[%s3748_s9 + $0x30] sm:$0xff]  }
 0x1dd   : > { %v3521_v32 = vpack.c.bf16 %v1132_v30, %v1131_v29  ;;  %v2913_v33 = vpop.f32.mrb[12].mxu1  ;;  %v3156_v29 = vld [vmem:[%s3748_s9 + $0x38] sm:$0xff]   ;;  %v3157_v30 = vld [vmem:[%s3754_s15] sm:$0xff]  }
 0x1de   : > { %v1093_v35 = vadd.f32 %v2913_v33, %v3513_v18  ;;  %v1084_v36 = vpop.f32.mrb[13].mxu1  ;;  %v3163_v33 = vld [vmem:[%s3750_s11 + $0x10] sm:$0xff]  }
 0x1df   : > { %v1085_v37 = vadd.f32 %v3513_v18, %v1084_v36  ;;  %v2914_v38 = vpop.f32.mrb[14].mxu1  ;;  %1296 = vmatmul.mubr.bf16.vlgmr.msra.gmra.mrb[24].mxu1 %v3521_v32 }
 0x1e0   : > { %v1096_v40 = vadd.f32 %v2914_v38, %v3513_v18  ;;  %v1087_v41 = vpop.f32.mrb[15].mxu1  ;;  %1305 = vmatprep.mubr.bf16.mxu1 %v3181_v2  ;;  %2924 = vmatpush3.bf16.msra.mxu1 %v3133_v3  ;;  %v1137_v47 = vmax.f32 %v1093_v35, 0.0 }
 0x1e1   : > { %v1088_v42 = vadd.f32 %v3513_v18, %v1087_v41  ;;  %2925 = vmatprep.subr.bf16.mxu1 %v3134_v34  ;;  %v1135_v50 = vmax.f32 %v1085_v37, 0.0  ;;  %v1171_v37 = vld [vmem:[%s3747_s8] sm:$0x3] }
 0x1e2   : > { %v1138_v48 = vmax.f32 %v1096_v40, 0.0 }
 0x1e3   : > { %v1136_v51 = vmax.f32 %v1088_v42, 0.0 }
 0x1e4   : > { %v3535_v46 = vpack.c.bf16 %v1138_v48, %v1137_v47  ;;  %2926 = vmatpush3.bf16.msra.mxu1 %v3134_v34  ;;  %v1173_v34 = vlaneseq }
 0x1e5   : > { %v1149_v53 = vpack.c.bf16 %v1136_v51, %v1135_v50  ;;  %2927 = vmatprep.subr.bf16.mxu1 %v3135_v45 }
 0x1e6   : > { %v1174_v35 = vshrl.u32 %v1173_v34, 7 }
 0x1e7   : > { %1306 = vmatmul.mubr.bf16.gmra.mrb[28].mxu1 %v3519_v31  ;;  %v2917_v49 = vpop.f32.mrb[16].mxu1 }
 0x1e8   : > { %v1109_v56 = vadd.f32 %v2917_v49, %v3513_v18  ;;  %1315 = vmatprep.mubr.bf16.mxu1 %v3181_v2  ;;  %v1100_v52 = vpop.f32.mrb[17].mxu1  ;;  %2928 = vmatpush3.bf16.msra.mxu1 %v3135_v45  ;;  %v1175_v36 = vsub.s32 0, %v1174_v35  ;;  %v1179_v38 = vsub.s32 1, %v1174_v35 }
 0x1e9   : > { %v1101_v57 = vadd.f32 %v3513_v18, %v1100_v52  ;;  %v2918_v58 = vpop.f32.mrb[18].mxu1  ;;  %2929 = vmatprep.subr.bf16.mxu1 %v3136_v54 }
 0x1ea   : > { %v1141_v63 = vmax.f32 %v1109_v56, 0.0  ;;  %v1112_v44 = vadd.f32 %v2918_v58, %v3513_v18  ;;  %v1103_v0 = vpop.f32.mrb[19].mxu1  ;;  %v3598_v40 = vrot.slane %v1171_v37, %v1175_v36  ;;  %v3600_v41 = vrot.slane %v1171_v37, %v1179_v38 }
 0x1eb   : > { %v1139_v1 = vmax.f32 %v1101_v57, 0.0  ;;  %v1104_v3 = vadd.f32 %v3513_v18, %v1103_v0  ;;  %v3158_v0 = vld [vmem:[%s3754_s15 + $0x8] sm:$0xff]  }
 0x1ec   : > { %v1142_v4 = vmax.f32 %v1112_v44, 0.0  ;;  %2930 = vmatpush3.bf16.msra.mxu1 %v3136_v54 }
 0x1ed   : > { %v1140_v5 = vmax.f32 %v1104_v3, 0.0  ;;  %2931 = vmatprep.subr.bf16.mxu1 %v3137_v59 }
 0x1ee   : > { %v1152_v7 = vpack.c.bf16 %v1142_v4, %v1141_v63 }
 0x1ef   : > { %1316 = vmatmul.mubr.bf16.gmra.mrb[32].mxu1 %v1149_v53  ;;  %v1151_v8 = vpack.c.bf16 %v1140_v5, %v1139_v1  ;;  %v2921_v9 = vpop.f32.mrb[20].mxu1 }
 0x1f0   : > { %1325 = vmatprep.mubr.bf16.mxu1 %v3181_v2  ;;  %v1125_v10 = vadd.f32 %v2921_v9, %v3513_v18  ;;  %v1116_v11 = vpop.f32.mrb[21].mxu1  ;;  %2932 = vmatpush3.bf16.msra.mxu1 %v3137_v59  ;;  %v3159_v9 = vld [vmem:[%s3754_s15 + $0x10] sm:$0xff]  }
 0x1f1   : > { %v1117_v12 = vadd.f32 %v3513_v18, %v1116_v11  ;;  %v2922_v13 = vpop.f32.mrb[22].mxu1  ;;  %2933 = vmatprep.subr.bf16.mxu1 %v3138_v6 }
 0x1f2   : > { %v1145_v17 = vmax.f32 %v1125_v10, 0.0  ;;  %v1128_v19 = vadd.f32 %v2922_v13, %v3513_v18  ;;  %v1119_v20 = vpop.f32.mrb[23].mxu1 }
 0x1f3   : > { %v1143_v21 = vmax.f32 %v1117_v12, 0.0  ;;  %v1120_v22 = vadd.f32 %v3513_v18, %v1119_v20  ;;  %v3153_v18 = vld [vmem:[%s3748_s9 + $0x70] sm:$0xff]   ;;  %v3160_v20 = vld [vmem:[%s3754_s15 + $0x18] sm:$0xff]  }
 0x1f4   : > { %v1146_v23 = vmax.f32 %v1128_v19, 0.0  ;;  %2934 = vmatpush3.bf16.msra.mxu1 %v3138_v6  ;;  %2753 = vmatprep.subr.bf16.mxu0 %v3153_v18 }
 0x1f5   : > { %v1144_v24 = vmax.f32 %v1120_v22, 0.0  ;;  %2935 = vmatprep.subr.bf16.mxu1 %v3139_v14  ;;  %2754 = vmatpush3.bf16.msra.mxu0 %v3154_v28 }
 0x1f6   : > { %v1154_v26 = vpack.c.bf16 %v1146_v23, %v1145_v17 }
 0x1f7   : > { %1326 = vmatmul.mubr.bf16.gmra.mrb[36].mxu1 %v3535_v46  ;;  %v1153_v27 = vpack.c.bf16 %v1144_v24, %v1143_v21 }
 0x1f8   : > { %1335 = vmatprep.mubr.bf16.mxu1 %v3181_v2  ;;  %2936 = vmatpush3.bf16.msra.mxu1 %v3139_v14 }
 0x1f9   : > { %2937 = vmatprep.subr.bf16.mxu1 %v3140_v25 }
 0x1fc   : > { %2938 = vmatpush3.bf16.msra.mxu1 %v3140_v25 }
 0x1ff   : > { %1336 = vmatmul.mubr.bf16.gmra.mrb[40].mxu1 %v1151_v8 }
 0x200   : > { %1345 = vmatprep.mubr.bf16.mxu1 %v3181_v2 }
 0x207   : > { %1346 = vmatmul.mubr.bf16.gmra.mrb[44].mxu1 %v1152_v7 }
 0x208   : > { %1355 = vmatprep.mubr.bf16.mxu1 %v3181_v2 }
 0x20f   : > { %1356 = vmatmul.mubr.bf16.gmra.mrb[48].mxu1 %v1153_v27 }
 0x210   : > { %1365 = vmatprep.mubr.bf16.mxu1 %v3181_v2  ;;  %v3155_v2 = vld [vmem:[%s3748_s9 + $0x78] sm:$0xff]  }
 0x211   : > { %2755 = vmatprep.subr.bf16.mxu0 %v3155_v2 }
 0x212   : > { %2756 = vmatpush3.bf16.msra.mxu0 %v3156_v29 }
 0x213   : > { %2987 = vmatprep.subr.bf16.mxu0 %v3157_v30 }
 0x217   : > { %1366 = vmatmul.mubr.bf16.gmra.mrb[52].mxu1 %v1154_v26 }
 0x218   : > { %2939 = vmatprep.mubr.bf16.mxu1 %v3521_v32  ;;  %v3162_v32 = vld [vmem:[%s3750_s11 + $0x8] sm:$0xff]  }
 0x21f   : > { %2940 = vmatmul.mubr.bf16.vlgmr.msra.gmra.mrb[56].mxu1 %v3519_v31  ;;  %v3161_v31 = vld [vmem:[%s3750_s11] sm:$0xff]  }
 0x220   : > { %2943 = vmatprep.mubr.bf16.mxu1 %v1149_v53  ;;  %2955 = vmatprep.subr.bf16.mxu1 %v3161_v31 }
 0x221   : > { %2956 = vmatpush3.bf16.msra.mxu1 %v3161_v31 }
 0x222   : > { %2957 = vmatprep.subr.bf16.mxu1 %v3162_v32 }
 0x225   : > { %2958 = vmatpush3.bf16.msra.mxu1 %v3162_v32 }
 0x226   : > { %2959 = vmatprep.subr.bf16.mxu1 %v3163_v33 }
 0x227   : > { %2944 = vmatmul.mubr.bf16.gmra.mrb[60].mxu1 %v3535_v46 }
 0x228   : > { %2947 = vmatprep.mubr.bf16.mxu1 %v1151_v8 }
 0x229   : > { %2960 = vmatpush3.bf16.msra.mxu1 %v3163_v33 }
 0x22f   : > { %2948 = vmatmul.mubr.bf16.gmra.mrb[64].mxu1 %v1152_v7 }
 0x230   : > { %2951 = vmatprep.mubr.bf16.mxu1 %v1153_v27 }
 0x237   : > { %2952 = vmatmul.mubr.bf16.gmra.mrb[68].mxu1 %v1154_v26 }
 0x2b2   : > { %v1297_v42 = vpop.f32.mrb[24].mxu1 }
 0x2b3   : > { %v1298_v45 = vadd.f32 %v1297_v42, %v3598_v40  ;;  %v1299_v47 = vpop.f32.mrb[25].mxu1 }
 0x2b4   : > { %v1300_v48 = vadd.f32 %v1299_v47, %v3600_v41  ;;  %v1301_v50 = vpop.f32.mrb[26].mxu1 }
 0x2b5   : > { %v1302_v51 = vadd.f32 %v1301_v50, %v3598_v40  ;;  %v1303_v46 = vpop.f32.mrb[27].mxu1  ;;  %v1376_v54 = vmax.f32 %v1298_v45, 0.0 }
 0x2b6   : > { %v1304_v53 = vadd.f32 %v1303_v46, %v3600_v41  ;;  %v1377_v56 = vmax.f32 %v1300_v48, 0.0 }
 0x2b7   : > { %v1378_v49 = vmax.f32 %v1302_v51, 0.0 }
 0x2b8   : > { %v1379_v52 = vmax.f32 %v1304_v53, 0.0 }
 0x2b9   : > { %v1408_v57 = vpack.c.bf16 %v1378_v49, %v1376_v54 }
 0x2ba   : > { %v1409_v58 = vpack.c.bf16 %v1379_v52, %v1377_v56  ;;  %v1307_v59 = vpop.f32.mrb[28].mxu1 }
 0x2bb   : > { %v1308_v63 = vadd.f32 %v1307_v59, %v3598_v40  ;;  %v1309_v44 = vpop.f32.mrb[29].mxu1 }
 0x2bc   : > { %v1310_v1 = vadd.f32 %v1309_v44, %v3600_v41  ;;  %v1311_v3 = vpop.f32.mrb[30].mxu1  ;;  %1591 = vmatprep.mubr.bf16.mxu0 %v1409_v58 }
 0x2bd   : > { %v1312_v4 = vadd.f32 %v1311_v3, %v3598_v40  ;;  %v1313_v5 = vpop.f32.mrb[31].mxu1  ;;  %1592 = vmatmul.mubr.bf16.vlgmr.msra.gmra.mrb[16].mxu0 %v1408_v57  ;;  %v1380_v7 = vmax.f32 %v1308_v63, 0.0 }
 0x2be   : > { %v1314_v6 = vadd.f32 %v1313_v5, %v3600_v41  ;;  %2988 = vmatpush3.bf16.msra.mxu0 %v3157_v30  ;;  %v1381_v10 = vmax.f32 %v1310_v1, 0.0 }
 0x2bf   : > { %v1382_v8 = vmax.f32 %v1312_v4, 0.0  ;;  %2989 = vmatprep.subr.bf16.mxu0 %v3158_v0 }
 0x2c0   : > { %v1383_v11 = vmax.f32 %v1314_v6, 0.0 }
 0x2c1   : > { %v1410_v12 = vpack.c.bf16 %v1382_v8, %v1380_v7 }
 0x2c2   : > { %v1411_v13 = vpack.c.bf16 %v1383_v11, %v1381_v10  ;;  %v1317_v14 = vpop.f32.mrb[32].mxu1  ;;  %2990 = vmatpush3.bf16.msra.mxu0 %v3158_v0 }
 0x2c3   : > { %v1318_v17 = vadd.f32 %v1317_v14, %v3598_v40  ;;  %v1319_v19 = vpop.f32.mrb[33].mxu1  ;;  %2991 = vmatprep.subr.bf16.mxu0 %v3159_v9 }
 0x2c4   : > { %v1320_v21 = vadd.f32 %v1319_v19, %v3600_v41  ;;  %v1321_v22 = vpop.f32.mrb[34].mxu1  ;;  %1599 = vmatprep.mubr.bf16.mxu0 %v1411_v13 }
 0x2c5   : > { %v1322_v23 = vadd.f32 %v1321_v22, %v3598_v40  ;;  %v1323_v24 = vpop.f32.mrb[35].mxu1  ;;  %1600 = vmatmul.mubr.bf16.gmra.mrb[20].mxu0 %v1410_v12  ;;  %v1384_v26 = vmax.f32 %v1318_v17, 0.0 }
 0x2c6   : > { %v1324_v25 = vadd.f32 %v1323_v24, %v3600_v41  ;;  %2992 = vmatpush3.bf16.msra.mxu0 %v3159_v9  ;;  %v1385_v18 = vmax.f32 %v1320_v21, 0.0 }
 0x2c7   : > { %v1386_v27 = vmax.f32 %v1322_v23, 0.0  ;;  %2993 = vmatprep.subr.bf16.mxu0 %v3160_v20 }
 0x2c8   : > { %v1387_v28 = vmax.f32 %v1324_v25, 0.0 }
 0x2c9   : > { %v1412_v2 = vpack.c.bf16 %v1386_v27, %v1384_v26 }
 0x2ca   : > { %v1413_v29 = vpack.c.bf16 %v1387_v28, %v1385_v18  ;;  %v1327_v30 = vpop.f32.mrb[36].mxu1  ;;  %2994 = vmatpush3.bf16.msra.mxu0 %v3160_v20 }
 0x2cb   : > { %v1328_v31 = vadd.f32 %v1327_v30, %v3598_v40  ;;  %v1329_v32 = vpop.f32.mrb[37].mxu1 }
 0x2cc   : > { %v1330_v33 = vadd.f32 %v1329_v32, %v3600_v41  ;;  %v1331_v34 = vpop.f32.mrb[38].mxu1  ;;  %1607 = vmatprep.mubr.bf16.mxu0 %v1413_v29 }
 0x2cd   : > { %v1332_v35 = vadd.f32 %v1331_v34, %v3598_v40  ;;  %v1333_v36 = vpop.f32.mrb[39].mxu1  ;;  %1608 = vmatmul.mubr.bf16.gmra.mrb[24].mxu0 %v1412_v2  ;;  %v1388_v38 = vmax.f32 %v1328_v31, 0.0 }
 0x2ce   : > { %v1334_v37 = vadd.f32 %v1333_v36, %v3600_v41  ;;  %v1389_v45 = vmax.f32 %v1330_v33, 0.0 }
 0x2cf   : > { %v1390_v42 = vmax.f32 %v1332_v35, 0.0 }
 0x2d0   : > { %v1391_v47 = vmax.f32 %v1334_v37, 0.0 }
 0x2d1   : > { %v1414_v48 = vpack.c.bf16 %v1390_v42, %v1388_v38 }
 0x2d2   : > { %v1415_v50 = vpack.c.bf16 %v1391_v47, %v1389_v45  ;;  %v1337_v51 = vpop.f32.mrb[40].mxu1 }
 0x2d3   : > { %v1338_v46 = vadd.f32 %v1337_v51, %v3598_v40  ;;  %v1339_v53 = vpop.f32.mrb[41].mxu1 }
 0x2d4   : > { %v1340_v54 = vadd.f32 %v1339_v53, %v3600_v41  ;;  %v1341_v49 = vpop.f32.mrb[42].mxu1  ;;  %1615 = vmatprep.mubr.bf16.mxu0 %v1415_v50 }
 0x2d5   : > { %v1342_v56 = vadd.f32 %v1341_v49, %v3598_v40  ;;  %v1343_v52 = vpop.f32.mrb[43].mxu1  ;;  %1616 = vmatmul.mubr.bf16.gmra.mrb[28].mxu0 %v1414_v48  ;;  %v1392_v58 = vmax.f32 %v1338_v46, 0.0 }
 0x2d6   : > { %v1344_v57 = vadd.f32 %v1343_v52, %v3600_v41  ;;  %v1393_v63 = vmax.f32 %v1340_v54, 0.0 }
 0x2d7   : > { %v1394_v59 = vmax.f32 %v1342_v56, 0.0 }
 0x2d8   : > { %v1395_v44 = vmax.f32 %v1344_v57, 0.0 }
 0x2d9   : > { %v1416_v0 = vpack.c.bf16 %v1394_v59, %v1392_v58 }
 0x2da   : > { %v1417_v1 = vpack.c.bf16 %v1395_v44, %v1393_v63  ;;  %v1347_v3 = vpop.f32.mrb[44].mxu1 }
 0x2db   : > { %v1348_v4 = vadd.f32 %v1347_v3, %v3598_v40  ;;  %v1349_v5 = vpop.f32.mrb[45].mxu1 }
 0x2dc   : > { %v1350_v6 = vadd.f32 %v1349_v5, %v3600_v41  ;;  %v1351_v7 = vpop.f32.mrb[46].mxu1  ;;  %1623 = vmatprep.mubr.bf16.mxu0 %v1417_v1 }
 0x2dd   : > { %v1352_v8 = vadd.f32 %v1351_v7, %v3598_v40  ;;  %v1353_v9 = vpop.f32.mrb[47].mxu1  ;;  %1624 = vmatmul.mubr.bf16.gmra.mrb[32].mxu0 %v1416_v0  ;;  %v1396_v11 = vmax.f32 %v1348_v4, 0.0 }
 0x2de   : > { %v1354_v10 = vadd.f32 %v1353_v9, %v3600_v41  ;;  %v1397_v13 = vmax.f32 %v1350_v6, 0.0 }
 0x2df   : > { %v1398_v12 = vmax.f32 %v1352_v8, 0.0 }
 0x2e0   : > { %v1399_v14 = vmax.f32 %v1354_v10, 0.0 }
 0x2e1   : > { %v1418_v17 = vpack.c.bf16 %v1398_v12, %v1396_v11 }
 0x2e2   : > { %v1419_v19 = vpack.c.bf16 %v1399_v14, %v1397_v13  ;;  %v1357_v20 = vpop.f32.mrb[48].mxu1 }
 0x2e3   : > { %v1358_v21 = vadd.f32 %v1357_v20, %v3598_v40  ;;  %v1359_v22 = vpop.f32.mrb[49].mxu1 }
 0x2e4   : > { %v1360_v23 = vadd.f32 %v1359_v22, %v3600_v41  ;;  %v1361_v24 = vpop.f32.mrb[50].mxu1  ;;  %1631 = vmatprep.mubr.bf16.mxu0 %v1419_v19 }
 0x2e5   : > { %v1362_v25 = vadd.f32 %v1361_v24, %v3598_v40  ;;  %v1363_v26 = vpop.f32.mrb[51].mxu1  ;;  %1632 = vmatmul.mubr.bf16.gmra.mrb[36].mxu0 %v1418_v17  ;;  %v1400_v18 = vmax.f32 %v1358_v21, 0.0 }
 0x2e6   : > { %v1364_v27 = vadd.f32 %v1363_v26, %v3600_v41  ;;  %v1401_v2 = vmax.f32 %v1360_v23, 0.0 }
 0x2e7   : > { %v1402_v28 = vmax.f32 %v1362_v25, 0.0 }
 0x2e8   : > { %v1403_v29 = vmax.f32 %v1364_v27, 0.0 }
 0x2e9   : > { %v1420_v30 = vpack.c.bf16 %v1402_v28, %v1400_v18 }
 0x2ea   : > { %v1421_v31 = vpack.c.bf16 %v1403_v29, %v1401_v2  ;;  %v1367_v32 = vpop.f32.mrb[52].mxu1 }
 0x2eb   : > { %v1368_v33 = vadd.f32 %v1367_v32, %v3598_v40  ;;  %v1369_v34 = vpop.f32.mrb[53].mxu1 }
 0x2ec   : > { %v1370_v35 = vadd.f32 %v1369_v34, %v3600_v41  ;;  %v1371_v36 = vpop.f32.mrb[54].mxu1  ;;  %1639 = vmatprep.mubr.bf16.mxu0 %v1421_v31 }
 0x2ed   : > { %v1372_v37 = vadd.f32 %v1371_v36, %v3598_v40  ;;  %v1373_v38 = vpop.f32.mrb[55].mxu1  ;;  %1640 = vmatmul.mubr.bf16.gmra.mrb[40].mxu0 %v1420_v30  ;;  %v1404_v45 = vmax.f32 %v1368_v33, 0.0  ;;  %v3683_v40 = vld [vmem:[%s3749_s10] ss:$0 sm:$0xff] }
 0x2ee   : > { %v1374_v42 = vadd.f32 %v1373_v38, %v3600_v41  ;;  %v1405_v48 = vmax.f32 %v1370_v35, 0.0 }
 0x2ef   : > { %v1406_v47 = vmax.f32 %v1372_v37, 0.0 }
 0x2f0   : > { %v1407_v50 = vmax.f32 %v1374_v42, 0.0 }
 0x2f1   : > { %v1422_v51 = vpack.c.bf16 %v1406_v47, %v1404_v45 }
 0x2f2   : > { %v1423_v46 = vpack.c.bf16 %v1407_v50, %v1405_v48 }
 0x2f4   : > { %1647 = vmatprep.mubr.bf16.mxu0 %v1423_v46 }
 0x2f5   : > { %1648 = vmatmul.mubr.bf16.gmra.mrb[44].mxu0 %v1422_v51 }
 0x2f6   : > { %2995 = vmatprep.mubr.msk.bf16.mxu0 %vm1009_vm2, %v3379_v62  ;;  %v3164_v62 = vld [vmem:[%s3750_s11 + $0x18] sm:$0xff]  }
 0x2f7   : > { %2961 = vmatprep.subr.bf16.mxu1 %v3164_v62 }
 0x2f8   : > { %2962 = vmatpush3.bf16.msra.mxu1 %v3164_v62 }
 0x2fd   : > { %2996 = vmatmul.mubr.msk.bf16.vlgmr.msra.gmra.mrb[48].mxu0 %vm1009_vm2, %v3377_v61  ;;  %v3165_v61 = vld [vmem:[%s3750_s11 + $0x20] sm:$0xff]  }
 0x2fe   : > { %2999 = vmatprep.mubr.msk.bf16.mxu0 %vm1009_vm2, %v3403_v16  ;;  %2963 = vmatprep.subr.bf16.mxu1 %v3165_v61  ;;  %v3167_v16 = vld [vmem:[%s3750_s11 + $0x30] sm:$0xff]  }
 0x2ff   : > { %2964 = vmatpush3.bf16.msra.mxu1 %v3165_v61 }
 0x305   : > { %3000 = vmatmul.mubr.msk.bf16.gmra.mrb[52].mxu0 %vm1009_vm2, %v3401_v15  ;;  %v3166_v15 = vld [vmem:[%s3750_s11 + $0x28] sm:$0xff]  }
 0x306   : > { %3003 = vmatprep.mubr.msk.bf16.mxu0 %vm1009_vm2, %v3434_v43  ;;  %2965 = vmatprep.subr.bf16.mxu1 %v3166_v15  ;;  %v3169_v43 = vld [vmem:[%s3753_s14] sm:$0xff]  }
 0x307   : > { %2966 = vmatpush3.bf16.msra.mxu1 %v3166_v15  ;;  %3011 = vmatprep.subr.bf16.mxu0 %v3169_v43 }
 0x308   : > { %2967 = vmatprep.subr.bf16.mxu1 %v3167_v16  ;;  %3012 = vmatpush3.bf16.msra.mxu0 %v3169_v43 }
 0x30b   : > { %2968 = vmatpush3.bf16.msra.mxu1 %v3167_v16 }
 0x30d   : > { %3004 = vmatmul.mubr.msk.bf16.gmra.mrb[56].mxu0 %vm1009_vm2, %v3428_v39  ;;  %v3168_v39 = vld [vmem:[%s3750_s11 + $0x38] sm:$0xff]  }
 0x30e   : > { %3007 = vmatprep.mubr.msk.bf16.mxu0 %vm1009_vm2, %v3452_v55  ;;  %2969 = vmatprep.subr.bf16.mxu1 %v3168_v39 }
 0x30f   : > { %2970 = vmatpush3.bf16.msra.mxu1 %v3168_v39 }
 0x315   : > { %3008 = vmatmul.mubr.msk.bf16.gmra.mrb[60].mxu0 %vm1009_vm2, %v3450_v60  ;;  %v3170_v60 = vld [vmem:[%s3753_s14 + $0x8] sm:$0xff]  }
 0x316   : > { %3013 = vmatprep.subr.bf16.mxu0 %v3170_v60 }
 0x317   : > { %3014 = vmatpush3.bf16.msra.mxu0 %v3170_v60 }
 0x390   : > { %v2757_v55 = vpop.f32.mrb[16].mxu0 }
 0x391   : > { %v2758_v41 = vpop.f32.mrb[17].mxu0 }
 0x392   : > { %v2759_v53 = vadd.f32 %v2758_v41, %v2757_v55  ;;  %v2760_v54 = vpop.f32.mrb[18].mxu0 }
 0x393   : > { %v2761_v49 = vpop.f32.mrb[19].mxu0 }
 0x394   : > { %v1594_v56 = vadd.f32 %v2759_v53, %v3683_v40  ;;  %v2762_v52 = vadd.f32 %v2761_v49, %v2760_v54 }
 0x396   : > { %v1597_v57 = vadd.f32 %v2762_v52, %v3683_v40  ;;  %v1656_v58 = vmax.f32 %v1594_v56, 0.0 }
 0x398   : > { %v1657_v59 = vmax.f32 %v1597_v57, 0.0  ;;  %v2763_v63 = vpop.f32.mrb[20].mxu0 }
 0x399   : > { %v2764_v44 = vpop.f32.mrb[21].mxu0 }
 0x39a   : > { %v2765_v0 = vadd.f32 %v2764_v44, %v2763_v63  ;;  %v2766_v1 = vpop.f32.mrb[22].mxu0  ;;  %v1672_v3 = vpack.c.bf16 %v1657_v59, %v1656_v58 }
 0x39b   : > { %v2767_v4 = vpop.f32.mrb[23].mxu0 }
 0x39c   : > { %v1602_v5 = vadd.f32 %v2765_v0, %v3683_v40  ;;  %v2768_v6 = vadd.f32 %v2767_v4, %v2766_v1  ;;  %2971 = vmatprep.mubr.bf16.mxu1 %v1672_v3 }
 0x39e   : > { %v1605_v7 = vadd.f32 %v2768_v6, %v3683_v40  ;;  %v1658_v8 = vmax.f32 %v1602_v5, 0.0 }
 0x3a0   : > { %v1659_v9 = vmax.f32 %v1605_v7, 0.0  ;;  %v2769_v10 = vpop.f32.mrb[24].mxu0 }
 0x3a1   : > { %v2770_v11 = vpop.f32.mrb[25].mxu0 }
 0x3a2   : > { %v1673_v12 = vpack.c.bf16 %v1659_v9, %v1658_v8  ;;  %v2771_v13 = vadd.f32 %v2770_v11, %v2769_v10  ;;  %v2772_v14 = vpop.f32.mrb[26].mxu0 }
 0x3a3   : > { %v2773_v17 = vpop.f32.mrb[27].mxu0 }
 0x3a4   : > { %v1610_v19 = vadd.f32 %v2771_v13, %v3683_v40  ;;  %v2774_v20 = vadd.f32 %v2773_v17, %v2772_v14  ;;  %2972 = vmatmul.mubr.bf16.vlgmr.msra.gmra.mrb[56].mxu1 %v1673_v12  ;;  %v3171_v14 = vld [vmem:[%s3753_s14 + $0x10] sm:$0xff]   ;;  %v3172_v17 = vld [vmem:[%s3753_s14 + $0x18] sm:$0xff]  }
 0x3a5   : > { %3015 = vmatprep.subr.bf16.mxu0 %v3171_v14 }
 0x3a6   : > { %v1613_v21 = vadd.f32 %v2774_v20, %v3683_v40  ;;  %v1660_v22 = vmax.f32 %v1610_v19, 0.0  ;;  %3016 = vmatpush3.bf16.msra.mxu0 %v3171_v14 }
 0x3a7   : > { %3017 = vmatprep.subr.bf16.mxu0 %v3172_v17 }
 0x3a8   : > { %v1661_v23 = vmax.f32 %v1613_v21, 0.0  ;;  %v2775_v24 = vpop.f32.mrb[28].mxu0 }
 0x3a9   : > { %v2776_v25 = vpop.f32.mrb[29].mxu0 }
 0x3aa   : > { %v2777_v26 = vadd.f32 %v2776_v25, %v2775_v24  ;;  %v2778_v27 = vpop.f32.mrb[30].mxu0  ;;  %v1674_v18 = vpack.c.bf16 %v1661_v23, %v1660_v22  ;;  %3018 = vmatpush3.bf16.msra.mxu0 %v3172_v17 }
 0x3ab   : > { %v2779_v28 = vpop.f32.mrb[31].mxu0 }
 0x3ac   : > { %v1618_v2 = vadd.f32 %v2777_v26, %v3683_v40  ;;  %v2780_v29 = vadd.f32 %v2779_v28, %v2778_v27  ;;  %2975 = vmatprep.mubr.bf16.mxu1 %v1674_v18 }
 0x3ae   : > { %v1621_v30 = vadd.f32 %v2780_v29, %v3683_v40  ;;  %v1662_v31 = vmax.f32 %v1618_v2, 0.0 }
 0x3b0   : > { %v1663_v32 = vmax.f32 %v1621_v30, 0.0  ;;  %v2781_v33 = vpop.f32.mrb[32].mxu0 }
 0x3b1   : > { %v2782_v34 = vpop.f32.mrb[33].mxu0 }
 0x3b2   : > { %v2783_v35 = vadd.f32 %v2782_v34, %v2781_v33  ;;  %v2784_v36 = vpop.f32.mrb[34].mxu0  ;;  %v1675_v37 = vpack.c.bf16 %v1663_v32, %v1662_v31 }
 0x3b3   : > { %v2785_v38 = vpop.f32.mrb[35].mxu0 }
 0x3b4   : > { %v1626_v42 = vadd.f32 %v2783_v35, %v3683_v40  ;;  %v2786_v45 = vadd.f32 %v2785_v38, %v2784_v36  ;;  %2976 = vmatmul.mubr.bf16.gmra.mrb[60].mxu1 %v1675_v37 }
 0x3b6   : > { %v1629_v47 = vadd.f32 %v2786_v45, %v3683_v40  ;;  %v1664_v48 = vmax.f32 %v1626_v42, 0.0 }
 0x3b8   : > { %v1665_v50 = vmax.f32 %v1629_v47, 0.0  ;;  %v2787_v51 = vpop.f32.mrb[36].mxu0 }
 0x3b9   : > { %v2788_v46 = vpop.f32.mrb[37].mxu0 }
 0x3ba   : > { %v2789_v62 = vadd.f32 %v2788_v46, %v2787_v51  ;;  %v2790_v61 = vpop.f32.mrb[38].mxu0  ;;  %v1676_v15 = vpack.c.bf16 %v1665_v50, %v1664_v48 }
 0x3bb   : > { %v2791_v16 = vpop.f32.mrb[39].mxu0 }
 0x3bc   : > { %v1634_v39 = vadd.f32 %v2789_v62, %v3683_v40  ;;  %v2792_v43 = vadd.f32 %v2791_v16, %v2790_v61  ;;  %2979 = vmatprep.mubr.bf16.mxu1 %v1676_v15 }
 0x3be   : > { %v1637_v60 = vadd.f32 %v2792_v43, %v3683_v40  ;;  %v1666_v55 = vmax.f32 %v1634_v39, 0.0 }
 0x3c0   : > { %v1667_v41 = vmax.f32 %v1637_v60, 0.0  ;;  %v2793_v53 = vpop.f32.mrb[40].mxu0 }
 0x3c1   : > { %v2794_v54 = vpop.f32.mrb[41].mxu0 }
 0x3c2   : > { %v2795_v49 = vadd.f32 %v2794_v54, %v2793_v53  ;;  %v2796_v56 = vpop.f32.mrb[42].mxu0  ;;  %v1677_v52 = vpack.c.bf16 %v1667_v41, %v1666_v55 }
 0x3c3   : > { %v2797_v57 = vpop.f32.mrb[43].mxu0 }
 0x3c4   : > { %v1642_v58 = vadd.f32 %v2795_v49, %v3683_v40  ;;  %v2798_v59 = vadd.f32 %v2797_v57, %v2796_v56  ;;  %2980 = vmatmul.mubr.bf16.gmra.mrb[64].mxu1 %v1677_v52 }
 0x3c6   : > { %v1645_v63 = vadd.f32 %v2798_v59, %v3683_v40  ;;  %v1668_v44 = vmax.f32 %v1642_v58, 0.0 }
 0x3c8   : > { %v1669_v0 = vmax.f32 %v1645_v63, 0.0  ;;  %v2799_v1 = vpop.f32.mrb[44].mxu0 }
 0x3c9   : > { %v2800_v3 = vpop.f32.mrb[45].mxu0 }
 0x3ca   : > { %v2801_v4 = vadd.f32 %v2800_v3, %v2799_v1  ;;  %v2802_v5 = vpop.f32.mrb[46].mxu0  ;;  %v1678_v6 = vpack.c.bf16 %v1669_v0, %v1668_v44 }
 0x3cb   : > { %v2803_v7 = vpop.f32.mrb[47].mxu0 }
 0x3cc   : > { %v1650_v8 = vadd.f32 %v2801_v4, %v3683_v40  ;;  %v2804_v9 = vadd.f32 %v2803_v7, %v2802_v5  ;;  %2983 = vmatprep.mubr.bf16.mxu1 %v1678_v6 }
 0x3ce   : > { %v1653_v10 = vadd.f32 %v2804_v9, %v3683_v40  ;;  %v1670_v11 = vmax.f32 %v1650_v8, 0.0  ;;  %v2603_v40 = vld [vmem:[%s3752_s13] ss:$0 sm:$0xff] }
 0x3d0   : > { %v1671_v12 = vmax.f32 %v1653_v10, 0.0  ;;  %v2628_v10 = vld [vmem:[%s3755_s16] ss:$0 sm:$0xff] }
 0x3d2   : > { %v1679_v13 = vpack.c.bf16 %v1671_v12, %v1670_v11 }
 0x3d4   : > { %2984 = vmatmul.mubr.bf16.gmra.mrb[68].mxu1 %v1679_v13 }
 0x477   : > { %v2973_v19 = vpop.f32.mrb[56].mxu1 }
 0x478   : > { %v2011_v20 = vadd.f32 %v2973_v19, %v2603_v40  ;;  %v1939_v21 = vpop.f32.mrb[57].mxu1 }
 0x479   : > { %v2009_v22 = vadd.f32 %v2603_v40, %v1939_v21  ;;  %v2974_v23 = vpop.f32.mrb[58].mxu1 }
 0x47a   : > { %v2012_v24 = vadd.f32 %v2974_v23, %v2603_v40  ;;  %v1942_v25 = vpop.f32.mrb[59].mxu1  ;;  %v2027_v27 = vmax.f32 %v2011_v20, 0.0 }
 0x47b   : > { %v2010_v26 = vadd.f32 %v2603_v40, %v1942_v25  ;;  %v2025_v28 = vmax.f32 %v2009_v22, 0.0 }
 0x47c   : > { %v2028_v18 = vmax.f32 %v2012_v24, 0.0 }
 0x47d   : > { %v2026_v2 = vmax.f32 %v2010_v26, 0.0 }
 0x47e   : > { %v2042_v29 = vpack.c.bf16 %v2028_v18, %v2027_v27 }
 0x47f   : > { %v2041_v30 = vpack.c.bf16 %v2026_v2, %v2025_v28 }
 0x481   : > { %3019 = vmatprep.mubr.msk.bf16.mxu0 %vm1009_vm2, %v2041_v30 }
 0x482   : > { %3020 = vmatmul.mubr.msk.bf16.vlgmr.msra.gmra.mrb[48].mxu0 %vm1009_vm2, %v2042_v29 }
 0x487   : > { %v2977_v31 = vpop.f32.mrb[60].mxu1 }
 0x488   : > { %v2015_v32 = vadd.f32 %v2977_v31, %v2603_v40  ;;  %v1955_v33 = vpop.f32.mrb[61].mxu1 }
 0x489   : > { %v2013_v34 = vadd.f32 %v2603_v40, %v1955_v33  ;;  %v2978_v35 = vpop.f32.mrb[62].mxu1 }
 0x48a   : > { %v2016_v36 = vadd.f32 %v2978_v35, %v2603_v40  ;;  %v1958_v37 = vpop.f32.mrb[63].mxu1  ;;  %v2031_v42 = vmax.f32 %v2015_v32, 0.0 }
 0x48b   : > { %v2014_v38 = vadd.f32 %v2603_v40, %v1958_v37  ;;  %v2029_v47 = vmax.f32 %v2013_v34, 0.0 }
 0x48c   : > { %v2032_v45 = vmax.f32 %v2016_v36, 0.0 }
 0x48d   : > { %v2030_v48 = vmax.f32 %v2014_v38, 0.0 }
 0x48e   : > { %v2044_v50 = vpack.c.bf16 %v2032_v45, %v2031_v42 }
 0x48f   : > { %v2043_v51 = vpack.c.bf16 %v2030_v48, %v2029_v47 }
 0x491   : > { %3023 = vmatprep.mubr.msk.bf16.mxu0 %vm1009_vm2, %v2043_v51 }
 0x492   : > { %3024 = vmatmul.mubr.msk.bf16.gmra.mrb[52].mxu0 %vm1009_vm2, %v2044_v50 }
 0x497   : > { %v2981_v46 = vpop.f32.mrb[64].mxu1 }
 0x498   : > { %v2019_v62 = vadd.f32 %v2981_v46, %v2603_v40  ;;  %v1971_v61 = vpop.f32.mrb[65].mxu1 }
 0x499   : > { %v2017_v15 = vadd.f32 %v2603_v40, %v1971_v61  ;;  %v2982_v16 = vpop.f32.mrb[66].mxu1 }
 0x49a   : > { %v2020_v39 = vadd.f32 %v2982_v16, %v2603_v40  ;;  %v1974_v43 = vpop.f32.mrb[67].mxu1  ;;  %v2035_v55 = vmax.f32 %v2019_v62, 0.0 }
 0x49b   : > { %v2018_v60 = vadd.f32 %v2603_v40, %v1974_v43  ;;  %v2033_v53 = vmax.f32 %v2017_v15, 0.0 }
 0x49c   : > { %v2036_v41 = vmax.f32 %v2020_v39, 0.0 }
 0x49d   : > { %v2034_v54 = vmax.f32 %v2018_v60, 0.0 }
 0x49e   : > { %v2046_v49 = vpack.c.bf16 %v2036_v41, %v2035_v55 }
 0x49f   : > { %v2045_v56 = vpack.c.bf16 %v2034_v54, %v2033_v53 }
 0x4a1   : > { %3027 = vmatprep.mubr.msk.bf16.mxu0 %vm1009_vm2, %v2045_v56 }
 0x4a2   : > { %3028 = vmatmul.mubr.msk.bf16.gmra.mrb[56].mxu0 %vm1009_vm2, %v2046_v49 }
 0x4a7   : > { %v2985_v52 = vpop.f32.mrb[68].mxu1 }
 0x4a8   : > { %v2023_v57 = vadd.f32 %v2985_v52, %v2603_v40  ;;  %v1987_v58 = vpop.f32.mrb[69].mxu1 }
 0x4a9   : > { %v2021_v59 = vadd.f32 %v2603_v40, %v1987_v58  ;;  %v2986_v63 = vpop.f32.mrb[70].mxu1 }
 0x4aa   : > { %v2024_v44 = vadd.f32 %v2986_v63, %v2603_v40  ;;  %v1990_v0 = vpop.f32.mrb[71].mxu1  ;;  %v2039_v3 = vmax.f32 %v2023_v57, 0.0 }
 0x4ab   : > { %v2022_v1 = vadd.f32 %v2603_v40, %v1990_v0  ;;  %v2037_v5 = vmax.f32 %v2021_v59, 0.0 }
 0x4ac   : > { %v2040_v4 = vmax.f32 %v2024_v44, 0.0 }
 0x4ad   : > { %v2038_v6 = vmax.f32 %v2022_v1, 0.0 }
 0x4ae   : > { %v2048_v7 = vpack.c.bf16 %v2040_v4, %v2039_v3 }
 0x4af   : > { %v2047_v8 = vpack.c.bf16 %v2038_v6, %v2037_v5 }
 0x4b1   : > { %3031 = vmatprep.mubr.msk.bf16.mxu0 %vm1009_vm2, %v2047_v8 }
 0x4b2   : > { %3032 = vmatmul.mubr.msk.bf16.gmra.mrb[60].mxu0 %vm1009_vm2, %v2048_v7 }
 0x555   : > { %v3021_v9 = vpop.f32.mrb[48].mxu0 }
 0x556   : > { %v2268_v11 = vpop.f32.mrb[49].mxu0  ;;  %v2340_v13 = vadd.f32 %v3021_v9, %v2628_v10 }
 0x557   : > { %v3022_v12 = vpop.f32.mrb[50].mxu0  ;;  %v2338_v40 = vadd.f32 %v2628_v10, %v2268_v11 }
 0x558   : > { %v2341_v14 = vadd.f32 %v3022_v12, %v2628_v10  ;;  %v2271_v17 = vpop.f32.mrb[51].mxu0 }
 0x559   : > { %v2339_v19 = vadd.f32 %v2628_v10, %v2271_v17 }
 0x55a   : > { %v2671_v20 = vpack.c.bf16 %v2341_v14, %v2340_v13 }
 0x55b   : > { %v2666_v21 = vpack.c.bf16 %v2339_v19, %v2338_v40 }
 0x55c   : > { %2703 = vst [vmem:[%s3726_s18 + $0x8] sm:$0xff] %v2671_v20  }
 0x55d   : > { %2667 = vst [vmem:[%s3726_s18] sm:$0xff] %v2666_v21  }
 0x565   : > { %v3025_v22 = vpop.f32.mrb[52].mxu0 }
 0x566   : > { %v2284_v23 = vpop.f32.mrb[53].mxu0  ;;  %v2344_v25 = vadd.f32 %v3025_v22, %v2628_v10 }
 0x567   : > { %v3026_v24 = vpop.f32.mrb[54].mxu0  ;;  %v2342_v18 = vadd.f32 %v2628_v10, %v2284_v23 }
 0x568   : > { %v2345_v26 = vadd.f32 %v3026_v24, %v2628_v10  ;;  %v2287_v27 = vpop.f32.mrb[55].mxu0 }
 0x569   : > { %v2343_v28 = vadd.f32 %v2628_v10, %v2287_v27 }
 0x56a   : > { %v2681_v2 = vpack.c.bf16 %v2345_v26, %v2344_v25 }
 0x56b   : > { %v2676_v29 = vpack.c.bf16 %v2343_v28, %v2342_v18 }
 0x56c   : > { %2705 = vst [vmem:[%s3726_s18 + $0x18] sm:$0xff] %v2681_v2  }
 0x56d   : > { %2704 = vst [vmem:[%s3726_s18 + $0x10] sm:$0xff] %v2676_v29  }
 0x575   : > { %v3029_v30 = vpop.f32.mrb[56].mxu0 }
 0x576   : > { %v2300_v31 = vpop.f32.mrb[57].mxu0  ;;  %v2348_v33 = vadd.f32 %v3029_v30, %v2628_v10 }
 0x577   : > { %v3030_v32 = vpop.f32.mrb[58].mxu0  ;;  %v2346_v36 = vadd.f32 %v2628_v10, %v2300_v31 }
 0x578   : > { %v2349_v34 = vadd.f32 %v3030_v32, %v2628_v10  ;;  %v2303_v35 = vpop.f32.mrb[59].mxu0 }
 0x579   : > { %v2347_v37 = vadd.f32 %v2628_v10, %v2303_v35 }
 0x57a   : > { %v2691_v38 = vpack.c.bf16 %v2349_v34, %v2348_v33 }
 0x57b   : > { %v2686_v42 = vpack.c.bf16 %v2347_v37, %v2346_v36 }
 0x57c   : > { %2707 = vst [vmem:[%s3726_s18 + $0x28] sm:$0xff] %v2691_v38  }
 0x57d   : > { %2706 = vst [vmem:[%s3726_s18 + $0x20] sm:$0xff] %v2686_v42  }
 0x585   : > { %v3033_v45 = vpop.f32.mrb[60].mxu0 }
 0x586   : > { %v2316_v47 = vpop.f32.mrb[61].mxu0  ;;  %v2352_v50 = vadd.f32 %v3033_v45, %v2628_v10 }
 0x587   : > { %v3034_v48 = vpop.f32.mrb[62].mxu0  ;;  %v2350_v62 = vadd.f32 %v2628_v10, %v2316_v47 }
 0x588   : > { %v2353_v51 = vadd.f32 %v3034_v48, %v2628_v10  ;;  %v2319_v46 = vpop.f32.mrb[63].mxu0 }
 0x589   : > { %v2351_v61 = vadd.f32 %v2628_v10, %v2319_v46 }
 0x58a   : > { %v2701_v15 = vpack.c.bf16 %v2353_v51, %v2352_v50 }
 0x58b   : > { %v2696_v16 = vpack.c.bf16 %v2351_v61, %v2350_v62 }
 0x58c   : > { %2709 = vst [vmem:[%s3726_s18 + $0x38] sm:$0xff] %v2701_v15  }
 0x58d   : > { %2708 = vst [vmem:[%s3726_s18 + $0x30] sm:$0xff] %v2696_v16  }
 0x58e PF: > { %s27_s24 = sadd.s32 1, %s3179_s24  }
 0x58f   : > { %p24_p4 = scmp.ge.s32.totalorder %s27_s24, 4  }
 0x591   :  { %26 = sbr.rel (!%p24_p4) target bundleno = 3 (0x3), region = 121 }

</bundles_post_ra>
